<compile_context>
chip_gen: v6e
topology: v6e:2x2x1
jax: 0.10.0
libtpu: 0.0.40
codegen_flags: <defaults>
</compile_context>

<pallas_src>
import math

import jax
import jax.numpy as jnp
from jax import lax
from jax.experimental import pallas as pl
from jax.experimental.pallas import tpu as pltpu


def _vmem_limit_bytes():
    """Chip-aware scoped-VMEM limit (v5e/v6e: 128 MiB physical, v7x: 64 MiB)."""
    try:
        cap = int(pltpu.get_tpu_info().vmem_capacity_bytes)
        return min((cap * 3) // 4, 96 * 1024 * 1024)
    except Exception:
        return 32 * 1024 * 1024


def _pick_band_rows(H, W, C, requested=None):
    """Pick TH (rows per band): a multiple of 4 dividing H, as large as VMEM allows."""
    if requested is not None:
        if H % requested != 0 or requested % 4 != 0:
            raise ValueError("band_rows must divide H and be a multiple of 4")
        return requested
    cands = [d for d in range(4, H + 1, 4) if H % d == 0]
    if not cands:
        # TODO(synk): H % 4 != 0 would need padding H up and slicing the output.
        raise ValueError(f"no band size (multiple of 4) divides H={H}")
    try:
        vmem = int(pltpu.get_tpu_info().vmem_capacity_bytes)
    except Exception:
        vmem = 64 * 1024 * 1024
    budget = vmem // 6
    # Rough per-band working set: double-buffered in/out blocks (f32) plus
    # ~6 band-sized value temporaries (framed copies, im2col patches, acc).
    per_band_row_bytes = 12 * W * C * 4
    best = cands[0]
    for d in cands:                       # ascending -> keep the largest fit
        if d * per_band_row_bytes <= budget:
            best = d
    return best


def _make_res_block_kernel(H, W, C, TH, scaling, mm_dtype):
    """Fused res_block kernel for one (batch, H row-band) grid point."""
    R1 = TH + 2          # conv1 output rows per band (1-row halo each side)
    C3 = 3 * C

    def conv3x3(src, rows, w_ref, b_ref):
        # src: (rows + 2, W + 2, C) zero-framed f32 input.
        # Per-kh im2col: 3 MXU matmuls with K = 3C, f32 accumulation.
        src_mm = src.astype(mm_dtype)
        acc = jnp.zeros((rows * W, C), jnp.float32)
        for kh in range(3):
            patch = jnp.concatenate(
                [src_mm[kh:kh + rows, kw:kw + W, :] for kw in range(3)],
                axis=-1).reshape(rows * W, C3)
            acc = acc + jnp.dot(patch, w_ref[kh * C3:(kh + 1) * C3, :],
                                preferred_element_type=jnp.float32)
        return acc + b_ref[...]          # bias added once per conv per band (f32)

    def frame_w(a, rows):
        # One zero column on each side of the W axis, in value form (no scratch).
        zcol = jnp.zeros((rows, 1, C), a.dtype)
        return jnp.concatenate([zcol, a, zcol], axis=1)

    def kernel(xa_ref, xb_ref, w1_ref, b1_ref, w2_ref, b2_ref, o_ref):
        # xa_ref: (TH, W, C)  band rows of the H-padded image
        # xb_ref: (4,  W, C)  4-row bottom halo block
        # w*_ref: (9C, C)     im2col weights, rows ordered (kh, kw, ci), mm_dtype
        # b*_ref: (1, C)      f32 biases
        # o_ref : (TH, W, C)  f32 output band
        hb = pl.program_id(1)

        # (TH + 4, W, C) f32 input window: band + 2-row halo on each side
        # (out-of-image rows are zero thanks to the 2-row host H padding).
        xwin = jnp.concatenate([xa_ref[...], xb_ref[...]], axis=0)

        # ---- conv1 + bias + ReLU over the band + 1-row halo -------------------
        y = conv3x3(frame_w(xwin, TH + 4), R1, w1_ref, b1_ref)
        y = jnp.maximum(y, 0.0).reshape(R1, W, C)

        # conv1 rows outside the image are conv2's zero padding; only the first
        # and last bands have such rows, and the select is a (R1,1,1) broadcast.
        ri = hb * TH - 1 + lax.broadcasted_iota(jnp.int32, (R1, 1, 1), 0)
        y = jnp.where(jnp.logical_and(ri >= 0, ri < H), y, 0.0)

        # ---- conv2 + bias (+ optional scaling) over the band ------------------
        z = conv3x3(frame_w(y, R1), TH, w2_ref, b2_ref)
        if scaling is not None:
            z = z * jnp.float32(scaling)

        # ---- residual add straight from the input window; store the band -----
        o_ref[...] = z.reshape(TH, W, C) + xwin[2:TH + 2]

    return kernel


def res_block_pallas_nhwc(x_nhwc, w1, b1, w2, b2, scaling=None,
                          band_rows=None, use_bf16=True):
    """Fused res_block forward on NHWC activations (no layout transposes).

    x_nhwc: (N, H, W, C) float; w1/w2: HWIO (3, 3, C, C); b1/b2: (C,).
    """
    N, H, W, C = x_nhwc.shape
    assert w1.shape == (3, 3, C, C) and w2.shape == (3, 3, C, C)
    assert b1.shape == (C,) and b2.shape == (C,)

    TH = _pick_band_rows(H, W, C, band_rows)
    n_hb = H // TH

    # Host-side prep: one cheap zero pad of 2 rows on each side of H so every
    # band's (TH + 4)-row window is a plain in-bounds BlockSpec read.  The
    # 1-column W halo and the conv1-output row halo are built in-kernel.
    x_pad = jnp.pad(x_nhwc.astype(jnp.float32), ((0, 0), (2, 2), (0, 0), (0, 0)))

    mm_dtype = jnp.bfloat16 if use_bf16 else jnp.float32
    w1m = w1.astype(jnp.float32).reshape(9 * C, C).astype(mm_dtype)  # rows=(kh,kw,ci)
    w2m = w2.astype(jnp.float32).reshape(9 * C, C).astype(mm_dtype)
    b1m = b1.astype(jnp.float32).reshape(1, C)
    b2m = b2.astype(jnp.float32).reshape(1, C)

    kernel = _make_res_block_kernel(H, W, C, TH, scaling, mm_dtype)

    out = pl.pallas_call(
        kernel,
        out_shape=jax.ShapeDtypeStruct((N, H, W, C), jnp.float32),
        grid_spec=pltpu.PrefetchScalarGridSpec(
            num_scalar_prefetch=0,
            grid=(N, n_hb),
            in_specs=[
                # band rows [hb*TH, (hb+1)*TH) of the H-padded image
                pl.BlockSpec((None, TH, W, C), lambda n, hb: (n, hb, 0, 0)),
                # 4-row bottom halo [(hb+1)*TH, (hb+1)*TH + 4)
                pl.BlockSpec((None, 4, W, C),
                             lambda n, hb: (n, (hb + 1) * (TH // 4), 0, 0)),
                pl.BlockSpec((9 * C, C), lambda n, hb: (0, 0)),
                pl.BlockSpec((1, C), lambda n, hb: (0, 0)),
                pl.BlockSpec((9 * C, C), lambda n, hb: (0, 0)),
                pl.BlockSpec((1, C), lambda n, hb: (0, 0)),
            ],
            out_specs=pl.BlockSpec((None, TH, W, C), lambda n, hb: (n, hb, 0, 0)),
        ),
        compiler_params=pltpu.CompilerParams(
            # No cross-band carry -> both axes parallel (v7x megacore).
            dimension_semantics=("parallel", "parallel"),
            vmem_limit_bytes=_vmem_limit_bytes(),
        ),
    )(x_pad, x_pad, w1m, b1m, w2m, b2m)
    return out


def res_block_pallas(x_nchw, w1, b1, w2, b2, scaling=None,
                     band_rows=None, use_bf16=True):
    """NCHW adapter matching the PyTorch module's interface."""
    # TODO(synk): at realistic sizes keep activations NHWC end-to-end and call
    #             res_block_pallas_nhwc directly (saves two full HBM round trips).
    x_nhwc = jnp.transpose(x_nchw, (0, 2, 3, 1))
    out = res_block_pallas_nhwc(x_nhwc, w1, b1, w2, b2, scaling=scaling,
                                band_rows=band_rows, use_bf16=use_bf16)
    return jnp.transpose(out, (0, 3, 1, 2))


def res_block_reference(x_nchw, w1, b1, w2, b2, scaling=None, use_bf16=True):
    """Pure-JAX reference (lax conv) mirroring the PyTorch module.

    With use_bf16=True the conv operands are rounded to bf16 (f32 accumulation),
    matching the kernel's MXU precision so a tight tolerance can be used.
    """
    mm = jnp.bfloat16 if use_bf16 else jnp.float32
    x = jnp.transpose(x_nchw, (0, 2, 3, 1)).astype(jnp.float32)
    dn = lax.conv_dimension_numbers(x.shape, w1.shape, ("NHWC", "HWIO", "NHWC"))

    def conv(a, w):
        return lax.conv_general_dilated(
            a.astype(mm), w.astype(jnp.float32).astype(mm), (1, 1),
            ((1, 1), (1, 1)), dimension_numbers=dn,
            preferred_element_type=jnp.float32)

    y = jnp.maximum(conv(x, w1) + b1.astype(jnp.float32), 0.0)
    z = conv(y, w2) + b2.astype(jnp.float32)
    if scaling is not None:
        z = z * scaling
    z = z + x
    return jnp.transpose(z, (0, 3, 1, 2))


if __name__ == "__main__":
    # Small shapes consistent with the module: in_channels == out_channels so
    # the residual add is well-formed (as in the PyTorch module's forward).
    N, C, H, W = 2, 4, 16, 16
    scaling = 0.5   # exercise the optional scaling path (module default is None)

    key = jax.random.PRNGKey(0)
    kx, k1, k2, k3, k4 = jax.random.split(key, 5)
    x = jax.random.normal(kx, (N, C, H, W), dtype=jnp.float32)

    # ~PyTorch Conv2d default init: U(-1/sqrt(fan_in), +1/sqrt(fan_in))
    fan_in = C * 3 * 3
    bound = 1.0 / math.sqrt(fan_in)
    w1 = jax.random.uniform(k1, (3, 3, C, C), jnp.float32, -bound, bound)  # HWIO
    b1 = jax.random.uniform(k2, (C,), jnp.float32, -bound, bound)
    w2 = jax.random.uniform(k3, (3, 3, C, C), jnp.float32, -bound, bound)  # HWIO
    b2 = jax.random.uniform(k4, (C,), jnp.float32, -bound, bound)

    # band_rows=8 -> 2 bands per image: exercises the row-halo handling.
    out = jax.block_until_ready(
        res_block_pallas(x, w1, b1, w2, b2, scaling=scaling, band_rows=8))
    ref = res_block_reference(x, w1, b1, w2, b2, scaling=scaling, use_bf16=True)

    assert out.shape == (N, C, H, W)
    # bf16 MXU operands (f32 accumulation) -> compare against a bf16-matched
    # reference; 1e-2 is generous for the remaining accumulation-order and
    # intermediate-rounding differences.
    assert jnp.allclose(out, ref, atol=1e-2, rtol=1e-2), "mismatch vs reference"

    print("KERNEL_OK")
</pallas_src>

<mosaic_0001>
module attributes {stable_mosaic.version = 11 : i64} {
  func.func @kernel(%arg0: i32, %arg1: i32, %arg2: memref<1x8x16x4xf32, #tpu.memory_space<vmem>>, %arg3: memref<1x4x16x4xf32, #tpu.memory_space<vmem>>, %arg4: memref<36x4xbf16, #tpu.memory_space<vmem>>, %arg5: memref<1x4xf32, #tpu.memory_space<vmem>>, %arg6: memref<36x4xbf16, #tpu.memory_space<vmem>>, %arg7: memref<1x4xf32, #tpu.memory_space<vmem>>, %arg8: memref<1x8x16x4xf32, #tpu.memory_space<vmem>>) attributes {dimension_semantics = [#tpu.dimension_semantics<parallel>, #tpu.dimension_semantics<parallel>], iteration_bounds = array<i64: 2, 2>, scalar_prefetch = 0 : i64, scratch_operands = 0 : i64, tpu.core_type = #tpu.core_type<tc>, window_params = [{transform_indices = @transform_0, window_bounds = array<i64: 1, 8, 16, 4>}, {transform_indices = @transform_1, window_bounds = array<i64: 1, 4, 16, 4>}, {pipeline_mode = #tpu.pipeline_mode<synchronous>, transform_indices = @transform_2, window_bounds = array<i64: 36, 4>}, {pipeline_mode = #tpu.pipeline_mode<synchronous>, transform_indices = @transform_3, window_bounds = array<i64: 1, 4>}, {pipeline_mode = #tpu.pipeline_mode<synchronous>, transform_indices = @transform_4, window_bounds = array<i64: 36, 4>}, {pipeline_mode = #tpu.pipeline_mode<synchronous>, transform_indices = @transform_5, window_bounds = array<i64: 1, 4>}, {transform_indices = @transform_6, window_bounds = array<i64: 1, 8, 16, 4>}]} {
    %c0 = arith.constant 0 : index
    %c0_0 = arith.constant 0 : index
    %c0_1 = arith.constant 0 : index
    %c0_2 = arith.constant 0 : index
    %0 = vector.load %arg2[%c0, %c0_0, %c0_1, %c0_2] : memref<1x8x16x4xf32, #tpu.memory_space<vmem>>, vector<1x8x16x4xf32>
    %1 = vector.shape_cast %0 : vector<1x8x16x4xf32> to vector<8x16x4xf32>
    %c0_3 = arith.constant 0 : index
    %c0_4 = arith.constant 0 : index
    %c0_5 = arith.constant 0 : index
    %c0_6 = arith.constant 0 : index
    %2 = vector.load %arg3[%c0_3, %c0_4, %c0_5, %c0_6] : memref<1x4x16x4xf32, #tpu.memory_space<vmem>>, vector<1x4x16x4xf32>
    %3 = vector.shape_cast %2 : vector<1x4x16x4xf32> to vector<4x16x4xf32>
    %4 = tpu.concatenate %1, %3 in 0 : vector<8x16x4xf32>, vector<4x16x4xf32> -> vector<12x16x4xf32>
    %cst = arith.constant 0.000000e+00 : f32
    %5 = vector.broadcast %cst : f32 to vector<12x1x4xf32>
    %6 = tpu.concatenate %5, %4, %5 in 1 : vector<12x1x4xf32>, vector<12x16x4xf32>, vector<12x1x4xf32> -> vector<12x18x4xf32>
    %7 = arith.truncf %6 : vector<12x18x4xf32> to vector<12x18x4xbf16>
    %cst_7 = arith.constant 0.000000e+00 : f32
    %8 = vector.broadcast %cst_7 : f32 to vector<160x4xf32>
    %9 = vector.extract_strided_slice %7 {offsets = [0, 0, 0], sizes = [10, 16, 4], strides = [1, 1, 1]} : vector<12x18x4xbf16> to vector<10x16x4xbf16>
    %10 = vector.extract_strided_slice %7 {offsets = [0, 1, 0], sizes = [10, 16, 4], strides = [1, 1, 1]} : vector<12x18x4xbf16> to vector<10x16x4xbf16>
    %11 = vector.extract_strided_slice %7 {offsets = [0, 2, 0], sizes = [10, 16, 4], strides = [1, 1, 1]} : vector<12x18x4xbf16> to vector<10x16x4xbf16>
    %12 = tpu.concatenate %9, %10, %11 in 2 : vector<10x16x4xbf16>, vector<10x16x4xbf16>, vector<10x16x4xbf16> -> vector<10x16x12xbf16>
    %13 = vector.shape_cast %12 : vector<10x16x12xbf16> to vector<160x12xbf16>
    %c0_8 = arith.constant 0 : index
    %c0_9 = arith.constant 0 : index
    %14 = vector.load %arg4[%c0_8, %c0_9] : memref<36x4xbf16, #tpu.memory_space<vmem>>, vector<12x4xbf16>
    %cst_10 = arith.constant dense<0.000000e+00> : vector<160x4xf32>
    %15 = tpu.matmul %13, %14, %cst_10 {dimension_numbers = #tpu.dot_dimension_numbers<[1], [0], [0], [1], [0, 0, 1, 1], [], []>} : vector<160x12xbf16>, vector<12x4xbf16>, vector<160x4xf32> -> vector<160x4xf32>
    %16 = arith.addf %8, %15 : vector<160x4xf32>
    %17 = vector.extract_strided_slice %7 {offsets = [1, 0, 0], sizes = [10, 16, 4], strides = [1, 1, 1]} : vector<12x18x4xbf16> to vector<10x16x4xbf16>
    %18 = vector.extract_strided_slice %7 {offsets = [1, 1, 0], sizes = [10, 16, 4], strides = [1, 1, 1]} : vector<12x18x4xbf16> to vector<10x16x4xbf16>
    %19 = vector.extract_strided_slice %7 {offsets = [1, 2, 0], sizes = [10, 16, 4], strides = [1, 1, 1]} : vector<12x18x4xbf16> to vector<10x16x4xbf16>
    %20 = tpu.concatenate %17, %18, %19 in 2 : vector<10x16x4xbf16>, vector<10x16x4xbf16>, vector<10x16x4xbf16> -> vector<10x16x12xbf16>
    %21 = vector.shape_cast %20 : vector<10x16x12xbf16> to vector<160x12xbf16>
    %c12 = arith.constant 12 : index
    %c0_11 = arith.constant 0 : index
    %22 = vector.load %arg4[%c12, %c0_11] : memref<36x4xbf16, #tpu.memory_space<vmem>>, vector<12x4xbf16>
    %cst_12 = arith.constant dense<0.000000e+00> : vector<160x4xf32>
    %23 = tpu.matmul %21, %22, %cst_12 {dimension_numbers = #tpu.dot_dimension_numbers<[1], [0], [0], [1], [0, 0, 1, 1], [], []>} : vector<160x12xbf16>, vector<12x4xbf16>, vector<160x4xf32> -> vector<160x4xf32>
    %24 = arith.addf %16, %23 : vector<160x4xf32>
    %25 = vector.extract_strided_slice %7 {offsets = [2, 0, 0], sizes = [10, 16, 4], strides = [1, 1, 1]} : vector<12x18x4xbf16> to vector<10x16x4xbf16>
    %26 = vector.extract_strided_slice %7 {offsets = [2, 1, 0], sizes = [10, 16, 4], strides = [1, 1, 1]} : vector<12x18x4xbf16> to vector<10x16x4xbf16>
    %27 = vector.extract_strided_slice %7 {offsets = [2, 2, 0], sizes = [10, 16, 4], strides = [1, 1, 1]} : vector<12x18x4xbf16> to vector<10x16x4xbf16>
    %28 = tpu.concatenate %25, %26, %27 in 2 : vector<10x16x4xbf16>, vector<10x16x4xbf16>, vector<10x16x4xbf16> -> vector<10x16x12xbf16>
    %29 = vector.shape_cast %28 : vector<10x16x12xbf16> to vector<160x12xbf16>
    %c24 = arith.constant 24 : index
    %c0_13 = arith.constant 0 : index
    %30 = vector.load %arg4[%c24, %c0_13] : memref<36x4xbf16, #tpu.memory_space<vmem>>, vector<12x4xbf16>
    %cst_14 = arith.constant dense<0.000000e+00> : vector<160x4xf32>
    %31 = tpu.matmul %29, %30, %cst_14 {dimension_numbers = #tpu.dot_dimension_numbers<[1], [0], [0], [1], [0, 0, 1, 1], [], []>} : vector<160x12xbf16>, vector<12x4xbf16>, vector<160x4xf32> -> vector<160x4xf32>
    %32 = arith.addf %24, %31 : vector<160x4xf32>
    %c0_15 = arith.constant 0 : index
    %c0_16 = arith.constant 0 : index
    %33 = vector.load %arg5[%c0_15, %c0_16] : memref<1x4xf32, #tpu.memory_space<vmem>>, vector<1x4xf32>
    %34 = vector.broadcast %33 : vector<1x4xf32> to vector<160x4xf32>
    %35 = arith.addf %32, %34 : vector<160x4xf32>
    %cst_17 = arith.constant 0.000000e+00 : f32
    %36 = vector.broadcast %cst_17 : f32 to vector<160x4xf32>
    %37 = arith.maximumf %35, %36 : vector<160x4xf32>
    %38 = vector.shape_cast %37 : vector<160x4xf32> to vector<10x16x4xf32>
    %c8_i32 = arith.constant 8 : i32
    %39 = arith.muli %arg1, %c8_i32 : i32
    %c1_i32 = arith.constant 1 : i32
    %40 = arith.subi %39, %c1_i32 : i32
    %41 = tpu.iota {dimensions = array<i32: 0>} : vector<10x1x1xi32>
    %42 = vector.broadcast %40 : i32 to vector<10x1x1xi32>
    %43 = arith.addi %42, %41 : vector<10x1x1xi32>
    %c0_i32 = arith.constant 0 : i32
    %44 = vector.broadcast %c0_i32 : i32 to vector<10x1x1xi32>
    %45 = arith.cmpi sge, %43, %44 : vector<10x1x1xi32>
    %c16_i32 = arith.constant 16 : i32
    %46 = vector.broadcast %c16_i32 : i32 to vector<10x1x1xi32>
    %47 = arith.cmpi slt, %43, %46 : vector<10x1x1xi32>
    %48 = arith.andi %45, %47 : vector<10x1x1xi1>
    %cst_18 = arith.constant 0.000000e+00 : f32
    %49 = vector.shape_cast %48 : vector<10x1x1xi1> to vector<10x1x1xi1>
    %50 = vector.broadcast %49 : vector<10x1x1xi1> to vector<10x16x4xi1>
    %51 = vector.broadcast %cst_18 : f32 to vector<10x16x4xf32>
    %52 = arith.select %50, %38, %51 : vector<10x16x4xi1>, vector<10x16x4xf32>
    %cst_19 = arith.constant 0.000000e+00 : f32
    %53 = vector.broadcast %cst_19 : f32 to vector<10x1x4xf32>
    %54 = tpu.concatenate %53, %52, %53 in 1 : vector<10x1x4xf32>, vector<10x16x4xf32>, vector<10x1x4xf32> -> vector<10x18x4xf32>
    %55 = arith.truncf %54 : vector<10x18x4xf32> to vector<10x18x4xbf16>
    %cst_20 = arith.constant 0.000000e+00 : f32
    %56 = vector.broadcast %cst_20 : f32 to vector<128x4xf32>
    %57 = vector.extract_strided_slice %55 {offsets = [0, 0, 0], sizes = [8, 16, 4], strides = [1, 1, 1]} : vector<10x18x4xbf16> to vector<8x16x4xbf16>
    %58 = vector.extract_strided_slice %55 {offsets = [0, 1, 0], sizes = [8, 16, 4], strides = [1, 1, 1]} : vector<10x18x4xbf16> to vector<8x16x4xbf16>
    %59 = vector.extract_strided_slice %55 {offsets = [0, 2, 0], sizes = [8, 16, 4], strides = [1, 1, 1]} : vector<10x18x4xbf16> to vector<8x16x4xbf16>
    %60 = tpu.concatenate %57, %58, %59 in 2 : vector<8x16x4xbf16>, vector<8x16x4xbf16>, vector<8x16x4xbf16> -> vector<8x16x12xbf16>
    %61 = vector.shape_cast %60 : vector<8x16x12xbf16> to vector<128x12xbf16>
    %c0_21 = arith.constant 0 : index
    %c0_22 = arith.constant 0 : index
    %62 = vector.load %arg6[%c0_21, %c0_22] : memref<36x4xbf16, #tpu.memory_space<vmem>>, vector<12x4xbf16>
    %cst_23 = arith.constant dense<0.000000e+00> : vector<128x4xf32>
    %63 = tpu.matmul %61, %62, %cst_23 {dimension_numbers = #tpu.dot_dimension_numbers<[1], [0], [0], [1], [0, 0, 1, 1], [], []>} : vector<128x12xbf16>, vector<12x4xbf16>, vector<128x4xf32> -> vector<128x4xf32>
    %64 = arith.addf %56, %63 : vector<128x4xf32>
    %65 = vector.extract_strided_slice %55 {offsets = [1, 0, 0], sizes = [8, 16, 4], strides = [1, 1, 1]} : vector<10x18x4xbf16> to vector<8x16x4xbf16>
    %66 = vector.extract_strided_slice %55 {offsets = [1, 1, 0], sizes = [8, 16, 4], strides = [1, 1, 1]} : vector<10x18x4xbf16> to vector<8x16x4xbf16>
    %67 = vector.extract_strided_slice %55 {offsets = [1, 2, 0], sizes = [8, 16, 4], strides = [1, 1, 1]} : vector<10x18x4xbf16> to vector<8x16x4xbf16>
    %68 = tpu.concatenate %65, %66, %67 in 2 : vector<8x16x4xbf16>, vector<8x16x4xbf16>, vector<8x16x4xbf16> -> vector<8x16x12xbf16>
    %69 = vector.shape_cast %68 : vector<8x16x12xbf16> to vector<128x12xbf16>
    %c12_24 = arith.constant 12 : index
    %c0_25 = arith.constant 0 : index
    %70 = vector.load %arg6[%c12_24, %c0_25] : memref<36x4xbf16, #tpu.memory_space<vmem>>, vector<12x4xbf16>
    %cst_26 = arith.constant dense<0.000000e+00> : vector<128x4xf32>
    %71 = tpu.matmul %69, %70, %cst_26 {dimension_numbers = #tpu.dot_dimension_numbers<[1], [0], [0], [1], [0, 0, 1, 1], [], []>} : vector<128x12xbf16>, vector<12x4xbf16>, vector<128x4xf32> -> vector<128x4xf32>
    %72 = arith.addf %64, %71 : vector<128x4xf32>
    %73 = vector.extract_strided_slice %55 {offsets = [2, 0, 0], sizes = [8, 16, 4], strides = [1, 1, 1]} : vector<10x18x4xbf16> to vector<8x16x4xbf16>
    %74 = vector.extract_strided_slice %55 {offsets = [2, 1, 0], sizes = [8, 16, 4], strides = [1, 1, 1]} : vector<10x18x4xbf16> to vector<8x16x4xbf16>
    %75 = vector.extract_strided_slice %55 {offsets = [2, 2, 0], sizes = [8, 16, 4], strides = [1, 1, 1]} : vector<10x18x4xbf16> to vector<8x16x4xbf16>
    %76 = tpu.concatenate %73, %74, %75 in 2 : vector<8x16x4xbf16>, vector<8x16x4xbf16>, vector<8x16x4xbf16> -> vector<8x16x12xbf16>
    %77 = vector.shape_cast %76 : vector<8x16x12xbf16> to vector<128x12xbf16>
    %c24_27 = arith.constant 24 : index
    %c0_28 = arith.constant 0 : index
    %78 = vector.load %arg6[%c24_27, %c0_28] : memref<36x4xbf16, #tpu.memory_space<vmem>>, vector<12x4xbf16>
    %cst_29 = arith.constant dense<0.000000e+00> : vector<128x4xf32>
    %79 = tpu.matmul %77, %78, %cst_29 {dimension_numbers = #tpu.dot_dimension_numbers<[1], [0], [0], [1], [0, 0, 1, 1], [], []>} : vector<128x12xbf16>, vector<12x4xbf16>, vector<128x4xf32> -> vector<128x4xf32>
    %80 = arith.addf %72, %79 : vector<128x4xf32>
    %c0_30 = arith.constant 0 : index
    %c0_31 = arith.constant 0 : index
    %81 = vector.load %arg7[%c0_30, %c0_31] : memref<1x4xf32, #tpu.memory_space<vmem>>, vector<1x4xf32>
    %82 = vector.broadcast %81 : vector<1x4xf32> to vector<128x4xf32>
    %83 = arith.addf %80, %82 : vector<128x4xf32>
    %cst_32 = arith.constant 5.000000e-01 : f32
    %84 = vector.broadcast %cst_32 : f32 to vector<128x4xf32>
    %85 = arith.mulf %83, %84 : vector<128x4xf32>
    %86 = vector.shape_cast %85 : vector<128x4xf32> to vector<8x16x4xf32>
    %87 = vector.extract_strided_slice %4 {offsets = [2, 0, 0], sizes = [8, 16, 4], strides = [1, 1, 1]} : vector<12x16x4xf32> to vector<8x16x4xf32>
    %88 = arith.addf %86, %87 : vector<8x16x4xf32>
    %c0_33 = arith.constant 0 : index
    %c0_34 = arith.constant 0 : index
    %c0_35 = arith.constant 0 : index
    %c0_36 = arith.constant 0 : index
    %89 = vector.load %arg8[%c0_33, %c0_34, %c0_35, %c0_36] : memref<1x8x16x4xf32, #tpu.memory_space<vmem>>, vector<1x8x16x4xf32>
    %90 = vector.shape_cast %89 : vector<1x8x16x4xf32> to vector<8x16x4xf32>
    %91 = vector.shape_cast %88 : vector<8x16x4xf32> to vector<1x8x16x4xf32>
    tpu.vector_store %arg8[%c0_33, %c0_34, %c0_35, %c0_36], %91 {strides = array<i32>} : memref<1x8x16x4xf32, #tpu.memory_space<vmem>>, vector<1x8x16x4xf32>,
    return
  }
  func.func @transform_0(%arg0: i32, %arg1: i32) -> (i32, i32, i32, i32) {
    %c0_i32 = arith.constant 0 : i32
    %c0_i32_0 = arith.constant 0 : i32
    %c0_i32_1 = arith.constant 0 : i32
    return %arg0, %arg1, %c0_i32, %c0_i32_0 : i32, i32, i32, i32
  }
  func.func @transform_1(%arg0: i32, %arg1: i32) -> (i32, i32, i32, i32) {
    %c1_i32 = arith.constant 1 : i32
    %0 = arith.addi %arg1, %c1_i32 : i32
    %c2_i32 = arith.constant 2 : i32
    %1 = arith.muli %0, %c2_i32 : i32
    %c0_i32 = arith.constant 0 : i32
    %c0_i32_0 = arith.constant 0 : i32
    %c0_i32_1 = arith.constant 0 : i32
    return %arg0, %1, %c0_i32, %c0_i32_0 : i32, i32, i32, i32
  }
  func.func @transform_2(%arg0: i32, %arg1: i32) -> (i32, i32) {
    %c0_i32 = arith.constant 0 : i32
    %c0_i32_0 = arith.constant 0 : i32
    %c0_i32_1 = arith.constant 0 : i32
    return %c0_i32, %c0_i32_0 : i32, i32
  }
  func.func @transform_3(%arg0: i32, %arg1: i32) -> (i32, i32) {
    %c0_i32 = arith.constant 0 : i32
    %c0_i32_0 = arith.constant 0 : i32
    %c0_i32_1 = arith.constant 0 : i32
    return %c0_i32, %c0_i32_0 : i32, i32
  }
  func.func @transform_4(%arg0: i32, %arg1: i32) -> (i32, i32) {
    %c0_i32 = arith.constant 0 : i32
    %c0_i32_0 = arith.constant 0 : i32
    %c0_i32_1 = arith.constant 0 : i32
    return %c0_i32, %c0_i32_0 : i32, i32
  }
  func.func @transform_5(%arg0: i32, %arg1: i32) -> (i32, i32) {
    %c0_i32 = arith.constant 0 : i32
    %c0_i32_0 = arith.constant 0 : i32
    %c0_i32_1 = arith.constant 0 : i32
    return %c0_i32, %c0_i32_0 : i32, i32
  }
  func.func @transform_6(%arg0: i32, %arg1: i32) -> (i32, i32, i32, i32) {
    %c0_i32 = arith.constant 0 : i32
    %c0_i32_0 = arith.constant 0 : i32
    %c0_i32_1 = arith.constant 0 : i32
    return %arg0, %arg1, %c0_i32, %c0_i32_0 : i32, i32, i32, i32
  }
}

</mosaic_0001>

<bundles_post_ra>
// kernel: tpu_custom_call.1
= control target key start
LH: loop header
LB: loop body
LE: loop exit
PB: predicated region body
PF: predicated region fallthrough
CT: control target
= control target key end

     0   :  { %s2733_s21 = smov 0   ;;  %s2735_s22 = smov 0   ;;  %s3606_s0 = inlined_call_operand.vmem [shape: f32[2,20,16,4], index: 0, kind: input, shape index: {}]   ;;  %s3607_s1 = inlined_call_operand.vmem [shape: f32[2,20,16,4], index: 1, kind: input, shape index: {}]   ;;  %s3608_s2 = inlined_call_operand.vmem [shape: bf16[36,4], index: 2, kind: input, shape index: {}]   ;;  %s3609_s3 = inlined_call_operand.vmem [shape: f32[1,4], index: 3, kind: input, shape index: {}]   ;;  %s3610_s4 = inlined_call_operand.vmem [shape: bf16[36,4], index: 4, kind: input, shape index: {}]   ;;  %s3611_s5 = inlined_call_operand.vmem [shape: f32[1,4], index: 5, kind: input, shape index: {}]   ;;  %s3612_s6 = inlined_call_operand.vmem [shape: f32[2,16,16,4], index: 6, kind: output, shape index: {}]  }
   0x1   :  { %s2737_s23 = smov 0   ;;  %s2739_s24 = smov 0  }
   0x2   :  { %s2741_s25 = smov 0  }
   0x3 LB: > { %s25_s26 = sadd.s32 1, %s2686_s23  ;;  %s28_s27 = sadd.s32 1, %s2690_s24  ;;  %s2694_s25 = sphi %s2741_s25, %s16_s25   ;;  %s2690_s24 = sphi %s2739_s24, %s3636_s24   ;;  %s2686_s23 = sphi %s2737_s23, %s3635_s23   ;;  %s2682_s22 = sphi %s2735_s22, %s3634_s22   ;;  %s2678_s21 = sphi %s2733_s21, %s3633_s21  }
   0x4   : > { %p26_p0 = scmp.ge.s32.totalorder %s25_s26, 2  ;;  %p2318_p1 = scmp.ge.s32.totalorder %s2694_s25, 1 }
   0x5   : > { %p270_p2 = scmp.lt.s32.totalorder %s2694_s25, 5 }
   0x6   : > { %s3638_s26 = smov (%p26_p0, %s25_s26), 0  ;;  %s3640_s27 = smov (!%p26_p0, %s28_s27), %s2690_s24 }
   0x7   : > { %p271_p3 = pnand %p2318_p1, %p270_p2  ;;  %p30_p4 = scmp.ge.s32.totalorder %s3640_s27, 2 }
   0x8   : > { %s2763_s28 = sshll.u32 (!%p271_p3), %s2678_s21, 3  ;;  %p333_p5 = scmp.lt.s32.totalorder (!%p271_p3), %s2682_s22, 1 }
   0x9   : > { %s3642_s27 = smov (%p30_p4, %s3640_s27), 0  ;;  %274 = sbr.rel (%p271_p3) target bundleno = 829 (0x33d), region = 44 }
   0xa   : > { %p335_p6 = scmp.lt.s32.totalorder (!%p271_p3), %s2763_s28, 19  ;;  %s2404_s8 = sadd.s32 (!%p271_p3), 8, %s2763_s28 }
   0xb   : > { %p353_p7 = scmp.lt.s32.totalorder (!%p271_p3), %s2404_s8, 19  ;;  %s2696_s16 = smov (!%p271_p3), 8  }
   0xc   : > { %s2697_s18 = smov (!%p271_p3), 4   ;;  %p366_p8 = scmp.lt.s32.totalorder (!%p271_p3), %s2763_s28, 15 }
   0xe   : > { %s3644_s22 = smov (!%p333_p5, %s2682_s22), 1  ;;  %vm423_vm0 = vcmask 1040384   ;;  %vm705_vm1 = vcmask 1046528   ;;  %s3646_s8 = smov (!%p353_p7, %s2404_s8), 19  ;;  %vm544_vm2 = vsmask.f32 7424 }
   0xf   : > { %s336_s29 = scalar_select %p335_p6, %s2763_s28, 19  ;;  %vm854_vm3 = vcmask 1045504   ;;  %vm756_vm4 = vcmask 31744   ;;  %vm777_vm5 = vcmask 64512   ;;  %vm833_vm6 = vcmask 97280  }
  0x10   : > { %s2591_s30 = smul.u32 40, %s3644_s22  ;;  %s2324_s14 = sshll.u32 %s3646_s8, 1 }
  0x11   : > { %s2320_s7 = sshll.u32 %s336_s29, 1 }
  0x12   : > { %s339_s9 = sadd.s32 %s2591_s30, %s2320_s7  ;;  %s2810_s15 = sadd.s32 %s2591_s30, %s2324_s14 }
  0x13   : > { %s2321_s10 = sshll.u32 %s339_s9, 3  ;;  %s2325_s17 = sshll.u32 %s2810_s15, 3 }
  0x14   : > { %s2776_s13 = scalar_lea.vmem %s3606_s0, %s2321_s10  ;;  %s2835_s21 = scalar_lea.vmem %s3607_s1, %s2325_s17 }
  0x15   : > { %v377_v0 = vld [vmem:[%s2776_s13 + $0x10] sm:$0xff]  ;;  %v378_v1 = vld [vmem:[%s2776_s13 + $0x18] sm:$0xff]  ;;  %v379_v2 = vld [vmem:[%s2776_s13 + $0x20] sm:$0xff]  ;;  %s2365_s14 = sadd.s32 4294967295, %s2763_s28  ;;  %s3648_s28 = smov (!%p366_p8, %s2763_s28), 15 }
  0x16   : > { %v427_v3 = vrot.slane %v377_v0, 7  ;;  %v428_v4 = vrot.slane %v378_v1, 7  ;;  %v380_v5 = vld [vmem:[%s2776_s13 + $0x28] sm:$0xff]  ;;  %v430_v6 = vrot.slane %v379_v2, 7  ;;  %v383_v7 = vld [vmem:[%s2776_s13 + $0x40] sm:$0xff]  ;;  %v381_v36 = vld [vmem:[%s2776_s13 + $0x30] sm:$0xff] }
  0x17   : > { %v384_v8 = vld [vmem:[%s2776_s13 + $0x48] sm:$0xff]  ;;  %v431_v9 = vrot.slane %v380_v5, 7  ;;  %v436_v10 = vrot.slane %v383_v7, 7  ;;  %v382_v37 = vld [vmem:[%s2776_s13 + $0x38] sm:$0xff]  ;;  %v433_v48 = vrot.slane %v381_v36, 7  ;;  %v387_v54 = vld [vmem:[%s2776_s13 + $0x60] sm:$0xff] }
  0x18   : > { %v437_v11 = vrot.slane %v384_v8, 7  ;;  %v429_v12 = vsel %vm423_vm0, %v427_v3, %v428_v4  ;;  %v497_v13 = vsel %vm423_vm0, 0.0, %v427_v3  ;;  %v509_v14 = vsel %vm423_vm0, %v428_v4, 0.0  ;;  %v388_v55 = vld [vmem:[%s2776_s13 + $0x68] sm:$0xff]  ;;  %v385_v8 = vld [vmem:[%s2776_s13 + $0x50] sm:$0xff] }
  0x19   : > { %v498_v15 = vsel %vm423_vm0, 0.0, %v430_v6  ;;  %v2790_v16 = vpack.c.bf16 %v429_v12, %v497_v13  ;;  %v523_v17 = vpack.c.bf16 %v509_v14, %v509_v14  ;;  %v432_v18 = vsel %vm423_vm0, %v430_v6, %v431_v9  ;;  %v386_v13 = vld [vmem:[%s2776_s13 + $0x58] sm:$0xff]  ;;  %v391_v14 = vld [vmem:[%s2835_s21] sm:$0xff] }
  0x1a   : > { %v510_v19 = vsel %vm423_vm0, %v431_v9, 0.0  ;;  %v2794_v20 = vpack.c.bf16 %v432_v18, %v498_v15  ;;  %v438_v22 = vsel %vm423_vm0, %v436_v10, %v437_v11  ;;  %v500_v23 = vsel %vm423_vm0, 0.0, %v436_v10  ;;  %v392_v15 = vld [vmem:[%s2835_s21 + $0x8] sm:$0xff] }
  0x1b   : > { %v525_v21 = vpack.c.bf16 %v510_v19, %v510_v19  ;;  %v709_v24 = vrot.slane %v2790_v16, 1  ;;  %v710_v25 = vrot.slane %v523_v17, 1  ;;  %v558_v26 = vshrl.u32 %v2790_v16, 16 }
  0x1c   : > { %v560_v27 = vshll.u32 %v2790_v16, 16  ;;  %v565_v28 = vshll.u32 %v523_v17, 16  ;;  %v712_v29 = vrot.slane %v2794_v20, 1  ;;  %v570_v31 = vshrl.u32 %v2794_v20, 16 }
  0x1d   : > { %v713_v30 = vrot.slane %v525_v21, 1  ;;  %v711_v32 = vsel %vm705_vm1, %v709_v24, %v710_v25  ;;  %v572_v34 = vshll.u32 %v2794_v20, 16  ;;  %v577_v35 = vshll.u32 %v525_v21, 16 }
  0x1e   : > { %v562_v33 = vrot.slane %v560_v27, 1  ;;  %738 = vrot.lane.b32.xlu1 %v711_v32, %s2696_s16  ;;  %v567_v38 = vrot.slane %v565_v28, 1  ;;  %v512_v40 = vsel %vm423_vm0, %v437_v11, 0.0  ;;  %v2815_v41 = vpack.c.bf16 %v438_v22, %v500_v23 }
  0x1f   : > { %v714_v39 = vsel %vm705_vm1, %v712_v29, %v713_v30  ;;  %v574_v43 = vrot.slane %v572_v34, 1  ;;  %v579_v44 = vrot.slane %v577_v35, 1  ;;  %v529_v45 = vpack.c.bf16 %v512_v40, %v512_v40 }
  0x20   : > { %v563_v42 = vor.u32 %v562_v33, %v558_v26  ;;  %v594_v46 = vshrl.u32 %v2815_v41, 16  ;;  %v596_v47 = vshll.u32 %v2815_v41, 16  ;;  %v434_v49 = vrot.slane %v382_v37, 7 }
  0x21   : > { %v575_v51 = vor.u32 %v574_v43, %v570_v31  ;;  %v601_v52 = vshll.u32 %v529_v45, 16  ;;  %v718_v53 = vrot.slane %v2815_v41, 1  ;;  %v499_v58 = vsel %vm423_vm0, 0.0, %v433_v48 }
  0x22   : > { %v568_v50 = vsel %vm544_vm2, %v563_v42, %v567_v38  ;;  %740 = vrot.lane.b32.xlu1 %v714_v39, %s2696_s16  ;;  %v598_v56 = vrot.slane %v596_v47, 1  ;;  %v435_v57 = vsel %vm423_vm0, %v433_v48, %v434_v49  ;;  %v511_v59 = vsel %vm423_vm0, %v434_v49, 0.0 }
  0x23   : > { %667 = vrot.lane.b32.xlu0 %v568_v50, %s2697_s18  ;;  %v580_v60 = vsel %vm544_vm2, %v575_v51, %v579_v44  ;;  %v603_v61 = vrot.slane %v601_v52, 1  ;;  %v2830_v62 = vpack.c.bf16 %v435_v57, %v499_v58  ;;  %v527_v63 = vpack.c.bf16 %v511_v59, %v511_v59  ;;  %v389_v51 = vld [vmem:[%s2776_s13 + $0x70] sm:$0xff] }
  0x24   : > { %v599_v0 = vor.u32 %v598_v56, %v594_v46  ;;  %v719_v1 = vrot.slane %v529_v45, 1  ;;  %v442_v2 = vrot.slane %v387_v54, 7  ;;  %v443_v3 = vrot.slane %v388_v55, 7  ;;  %v390_v56 = vld [vmem:[%s2776_s13 + $0x78] sm:$0xff] }
  0x25   : > { %v582_v4 = vshrl.u32 %v2830_v62, 16  ;;  %v584_v5 = vshll.u32 %v2830_v62, 16  ;;  %v589_v6 = vshll.u32 %v527_v63, 16  ;;  %v715_v7 = vrot.slane %v2830_v62, 1 }
  0x26   : > { %v604_v9 = vsel %vm544_vm2, %v599_v0, %v603_v61  ;;  %v720_v10 = vsel %vm705_vm1, %v718_v53, %v719_v1  ;;  %v716_v11 = vrot.slane %v527_v63, 1  ;;  %v444_v12 = vsel %vm423_vm0, %v442_v2, %v443_v3  ;;  %v393_v61 = vld [vmem:[%s2835_s21 + $0x10] sm:$0xff] }
  0x27   : > { %669 = vrot.lane.b32.xlu0 %v580_v60, %s2697_s18  ;;  %673 = vrot.lane.b32.xlu1 %v604_v9, %s2697_s18  ;;  %v586_v17 = vrot.slane %v584_v5, 1  ;;  %v591_v18 = vrot.slane %v589_v6, 1  ;;  %v502_v19 = vsel %vm423_vm0, 0.0, %v442_v2  ;;  %v514_v21 = vsel %vm423_vm0, %v443_v3, 0.0 }
  0x28   : > { %v717_v22 = vsel %vm705_vm1, %v715_v7, %v716_v11  ;;  %v2852_v23 = vpack.c.bf16 %v444_v12, %v502_v19  ;;  %v533_v24 = vpack.c.bf16 %v514_v21, %v514_v21  ;;  %v439_v25 = vrot.slane %v385_v8, 7  ;;  %v394_v7 = vld [vmem:[%s2835_s21 + $0x18] sm:$0xff]  ;;  %v395_v12 = vld [vmem:[%s2835_s21 + $0x20] sm:$0xff] }
  0x29   : > { %v587_v26 = vor.u32 %v586_v17, %v582_v4  ;;  %v440_v27 = vrot.slane %v386_v13, 7  ;;  %v448_v28 = vrot.slane %v391_v14, 7  ;;  %v449_v29 = vrot.slane %v392_v15, 7  ;;  %v396_v13 = vld [vmem:[%s2835_s21 + $0x28] sm:$0xff] }
  0x2a   : > { %v618_v30 = vshrl.u32 %v2852_v23, 16  ;;  %v620_v31 = vshll.u32 %v2852_v23, 16  ;;  %v625_v32 = vshll.u32 %v533_v24, 16  ;;  %v501_v33 = vsel %vm423_vm0, 0.0, %v439_v25 }
  0x2b   : > { %v592_v34 = vsel %vm544_vm2, %v587_v26, %v591_v18  ;;  %744 = vrot.lane.b32.xlu1 %v720_v10, %s2696_s16  ;;  %v441_v35 = vsel %vm423_vm0, %v439_v25, %v440_v27  ;;  %v513_v36 = vsel %vm423_vm0, %v440_v27, 0.0  ;;  %v724_v37 = vrot.slane %v2852_v23, 1 }
  0x2c   : > { %671 = vrot.lane.b32.xlu0 %v592_v34, %s2697_s18  ;;  %v622_v38 = vrot.slane %v620_v31, 1  ;;  %v627_v39 = vrot.slane %v625_v32, 1  ;;  %v2863_v40 = vpack.c.bf16 %v441_v35, %v501_v33  ;;  %v531_v42 = vpack.c.bf16 %v513_v36, %v513_v36 }
  0x2d   : > { %v725_v43 = vrot.slane %v533_v24, 1  ;;  %v450_v44 = vsel %vm423_vm0, %v448_v28, %v449_v29  ;;  %v504_v45 = vsel %vm423_vm0, 0.0, %v448_v28  ;;  %v516_v46 = vsel %vm423_vm0, %v449_v29, 0.0 }
  0x2e   : > { %v623_v47 = vor.u32 %v622_v38, %v618_v30  ;;  %v606_v48 = vshrl.u32 %v2863_v40, 16  ;;  %v608_v49 = vshll.u32 %v2863_v40, 16  ;;  %v613_v50 = vshll.u32 %v531_v42, 16 }
  0x2f   : > { %v726_v52 = vsel %vm705_vm1, %v724_v37, %v725_v43  ;;  %v721_v53 = vrot.slane %v2863_v40, 1  ;;  %v722_v54 = vrot.slane %v531_v42, 1  ;;  %v2873_v55 = vpack.c.bf16 %v450_v44, %v504_v45 }
  0x30   : > { %742 = vrot.lane.b32.xlu0 %v717_v22, %s2696_s16  ;;  %v628_v57 = vsel %vm544_vm2, %v623_v47, %v627_v39  ;;  %v610_v58 = vrot.slane %v608_v49, 1  ;;  %v615_v59 = vrot.slane %v613_v50, 1  ;;  %v537_v60 = vpack.c.bf16 %v516_v46, %v516_v46  ;;  %v375_v47 = vld [vmem:[%s2776_s13] sm:$0xff] }
  0x31   : > { %677 = vrot.lane.b32.xlu1 %v628_v57, %s2697_s18  ;;  %v723_v63 = vsel %vm705_vm1, %v721_v53, %v722_v54  ;;  %v642_v0 = vshrl.u32 %v2873_v55, 16  ;;  %v644_v1 = vshll.u32 %v2873_v55, 16  ;;  %v445_v2 = vrot.slane %v389_v51, 7  ;;  %v376_v57 = vld [vmem:[%s2776_s13 + $0x8] sm:$0xff] }
  0x32   : > { %v611_v3 = vor.u32 %v610_v58, %v606_v48  ;;  %v649_v4 = vshll.u32 %v537_v60, 16  ;;  %v446_v5 = vrot.slane %v390_v56, 7  ;;  %v730_v6 = vrot.slane %v2873_v55, 1 }
  0x33   : > { %v646_v8 = vrot.slane %v644_v1, 1  ;;  %v503_v9 = vsel %vm423_vm0, 0.0, %v445_v2  ;;  %v731_v10 = vrot.slane %v537_v60, 1  ;;  %v451_v11 = vrot.slane %v393_v61, 7 }
  0x34   : > { %v616_v14 = vsel %vm544_vm2, %v611_v3, %v615_v59  ;;  %v651_v15 = vrot.slane %v649_v4, 1  ;;  %v447_v17 = vsel %vm423_vm0, %v445_v2, %v446_v5  ;;  %v515_v18 = vsel %vm423_vm0, %v446_v5, 0.0  ;;  %v2636_v4 = vld [vmem:[%s3608_s2] sm:$0x3f]  }
  0x35   : > { %675 = vrot.lane.b32.xlu0 %v616_v14, %s2697_s18  ;;  %748 = vrot.lane.b32.xlu1 %v726_v52, %s2696_s16  ;;  %v647_v19 = vor.u32 %v646_v8, %v642_v0  ;;  %v2893_v21 = vpack.c.bf16 %v447_v17, %v503_v9  ;;  %v535_v22 = vpack.c.bf16 %v515_v18, %v515_v18  ;;  %v452_v24 = vrot.slane %v394_v7, 7  ;;  %v398_v9 = vld [vmem:[%s2835_s21 + $0x38] sm:$0xff] }
  0x36   : > { %v732_v25 = vsel %vm705_vm1, %v730_v6, %v731_v10  ;;  %v505_v26 = vsel %vm423_vm0, 0.0, %v451_v11  ;;  %v454_v27 = vrot.slane %v395_v12, 7  ;;  %v455_v28 = vrot.slane %v396_v13, 7  ;;  %v2634_v10 = vld [vmem:[%s3608_s2 + $0x4] sm:$0xfc]   ;;  %2586 = vmatprep.subr.msk.bf16.mxu1 %vm854_vm3, %v2636_v4 }
  0x37   : > { %v652_v29 = vsel %vm544_vm2, %v647_v19, %v651_v15  ;;  %v630_v30 = vshrl.u32 %v2893_v21, 16  ;;  %v632_v31 = vshll.u32 %v2893_v21, 16  ;;  %v637_v32 = vshll.u32 %v535_v22, 16 }
  0x38   : > { %v727_v33 = vrot.slane %v2893_v21, 1  ;;  %v728_v34 = vrot.slane %v535_v22, 1  ;;  %v453_v35 = vsel %vm423_vm0, %v451_v11, %v452_v24  ;;  %v517_v36 = vsel %vm423_vm0, %v452_v24, 0.0 }
  0x39   : > { %746 = vrot.lane.b32.xlu0 %v723_v63, %s2696_s16  ;;  %681 = vrot.lane.b32.xlu1 %v652_v29, %s2697_s18  ;;  %v634_v37 = vrot.slane %v632_v31, 1  ;;  %v639_v38 = vrot.slane %v637_v32, 1  ;;  %v2905_v39 = vpack.c.bf16 %v453_v35, %v505_v26  ;;  %v539_v42 = vpack.c.bf16 %v517_v36, %v517_v36  ;;  %v397_v63 = vld [vmem:[%s2835_s21 + $0x30] sm:$0xff] }
  0x3a   : > { %v729_v43 = vsel %vm705_vm1, %v727_v33, %v728_v34  ;;  %v456_v44 = vsel %vm423_vm0, %v454_v27, %v455_v28  ;;  %v506_v45 = vsel %vm423_vm0, 0.0, %v454_v27  ;;  %v518_v46 = vsel %vm423_vm0, %v455_v28, 0.0  ;;  %v2635_v36 = vld [vmem:[%s3608_s2 + $0xc] sm:$0x3f]  }
  0x3b   : > { %v635_v48 = vor.u32 %v634_v37, %v630_v30  ;;  %v654_v49 = vshrl.u32 %v2905_v39, 16  ;;  %v656_v50 = vshll.u32 %v2905_v39, 16  ;;  %v661_v51 = vshll.u32 %v539_v42, 16 }
  0x3c   : > { %v733_v52 = vrot.slane %v2905_v39, 1  ;;  %v734_v53 = vrot.slane %v539_v42, 1  ;;  %v2915_v54 = vpack.c.bf16 %v456_v44, %v506_v45  ;;  %v541_v56 = vpack.c.bf16 %v518_v46, %v518_v46 }
  0x3d   : > { %v640_v58 = vsel %vm544_vm2, %v635_v48, %v639_v38  ;;  %752 = vrot.lane.b32.xlu1 %v732_v25, %s2696_s16  ;;  %v658_v59 = vrot.slane %v656_v50, 1  ;;  %v663_v60 = vrot.slane %v661_v51, 1  ;;  %v424_v61 = vrot.slane %v375_v47, 7 }
  0x3e   : > { %679 = vrot.lane.b32.xlu0 %v640_v58, %s2697_s18  ;;  %v735_v0 = vsel %vm705_vm1, %v733_v52, %v734_v53  ;;  %v801_v1 = vshrl.u32 %v2915_v54, 16  ;;  %v803_v2 = vshll.u32 %v2915_v54, 16  ;;  %v808_v3 = vshll.u32 %v541_v56, 16 }
  0x3f   : > { %v659_v5 = vor.u32 %v658_v59, %v654_v49  ;;  %v816_v6 = vrot.slane %v2915_v54, 1  ;;  %v817_v7 = vrot.slane %v541_v56, 1  ;;  %v425_v8 = vrot.slane %v376_v57, 7 }
  0x40   : > { %v805_v11 = vrot.slane %v803_v2, 1  ;;  %v496_v12 = vsel %vm423_vm0, 0.0, %v424_v61  ;;  %v457_v13 = vrot.slane %v397_v63, 7  ;;  %v810_v14 = vrot.slane %v808_v3, 1 }
  0x41   : > { %754 = vrot.lane.b32.xlu1 %v735_v0, %s2696_s16  ;;  %v818_v15 = vsel %vm705_vm1, %v816_v6, %v817_v7  ;;  %v426_v17 = vsel %vm423_vm0, %v424_v61, %v425_v8  ;;  %v508_v18 = vsel %vm423_vm0, %v425_v8, 0.0  ;;  %v458_v25 = vrot.slane %v398_v9, 7 }
  0x42   : > { %750 = vrot.lane.b32.xlu0 %v729_v43, %s2696_s16  ;;  %v806_v19 = vor.u32 %v805_v11, %v801_v1  ;;  %v2940_v22 = vpack.c.bf16 %v426_v17, %v496_v12  ;;  %v521_v24 = vpack.c.bf16 %v508_v18, %v508_v18  ;;  %v664_v26 = vsel %vm544_vm2, %v659_v5, %v663_v60 }
  0x43   : > { %v507_v27 = vsel %vm423_vm0, 0.0, %v457_v13  ;;  %v832_v28 = vrot.slane %v2634_v10, 2  ;;  %v459_v34 = vsel %vm423_vm0, %v457_v13, %v458_v25  ;;  %v519_v35 = vsel %vm423_vm0, %v458_v25, 0.0 }
  0x44   : > { %v546_v29 = vshrl.u32 %v2940_v22, 16  ;;  %v548_v30 = vshll.u32 %v2940_v22, 16  ;;  %v553_v31 = vshll.u32 %v521_v24, 16  ;;  %v706_v32 = vrot.slane %v2940_v22, 1 }
  0x45   : > { %819 = vrot.lane.b32.xlu1 %v818_v15, %s2696_s16  ;;  %v707_v33 = vrot.slane %v521_v24, 1  ;;  %2585 = vmatprep.subr.msk.bf16.mxu0 %vm854_vm3, %v832_v28  ;;  %v811_v37 = vsel %vm544_vm2, %v806_v19, %v810_v14  ;;  %v2956_v42 = vpack.c.bf16 %v459_v34, %v507_v27  ;;  %v543_v43 = vpack.c.bf16 %v519_v35, %v519_v35 }
  0x46   : > { %683 = vrot.lane.b32.xlu0 %v664_v26, %s2697_s18  ;;  %v550_v38 = vrot.slane %v548_v30, 1  ;;  %v555_v44 = vrot.slane %v553_v31, 1  ;;  %v856_v46 = vsel %vm854_vm3, %v832_v28, 0  ;;  %v979_v47 = vsel %vm854_vm3, %v2636_v4, 0 }
  0x47   : > { %v708_v45 = vsel %vm705_vm1, %v706_v32, %v707_v33  ;;  %v1095_v49 = vshrl.u32 %v2956_v42, 16  ;;  %v1097_v50 = vshll.u32 %v2956_v42, 16  ;;  %v1102_v51 = vshll.u32 %v543_v43, 16  ;;  %2466 = vmatpush3.bf16.msra.mxu0 %v856_v46  ;;  %2488 = vmatpush3.bf16.msra.mxu1 %v979_v47 }
  0x48   : > { %v551_v48 = vor.u32 %v550_v38, %v546_v29  ;;  %v1110_v52 = vrot.slane %v2956_v42, 1  ;;  %v1111_v53 = vrot.slane %v543_v43, 1  ;;  %2587 = vmatprep.subr.msk.bf16.mxu0 %vm854_vm3, %v2635_v36  ;;  %v1129_v7 = vsel %vm854_vm3, %v2635_v36, 0 }
  0x49   : > { %736 = vrot.lane.b32.xlu1 %v708_v45, %s2696_s16  ;;  %v1099_v56 = vrot.slane %v1097_v50, 1  ;;  %v1104_v58 = vrot.slane %v1102_v51, 1 }
  0x4a   : > { %812 = vrot.lane.b32.xlu0 %v811_v37, %s2697_s18  ;;  %v556_v57 = vsel %vm544_vm2, %v551_v48, %v555_v44  ;;  %v1112_v59 = vsel %vm705_vm1, %v1110_v52, %v1111_v53 }
  0x4b   : > { %v1100_v60 = vor.u32 %v1099_v56, %v1095_v49  ;;  %v2637_v49 = vld [vmem:[%s3610_s4 + $0x4] sm:$0xfc]  }
  0x4c   : > { %v1747_v51 = vrot.slane %v2637_v49, 2 }
  0x4d   : > { %1113 = vrot.lane.b32.xlu1 %v1112_v59, %s2696_s16  ;;  %v1105_v61 = vsel %vm544_vm2, %v1100_v60, %v1104_v58 }
  0x4e   : > { %665 = vrot.lane.b32.xlu0 %v556_v57, %s2697_s18  ;;  %2588 = vmatprep.subr.msk.bf16.mxu1 %vm854_vm3, %v1747_v51 }
  0x52   : > { %1106 = vrot.lane.b32.xlu0 %v1105_v61, %s2697_s18 }
  0x90   : > { %v739_v63 = vpop.permute.xlu1 %738 }
  0x94   : > { %v741_v1 = vpop.permute.xlu1 %740 }
  0x95   : > { %v668_v0 = vpop.permute.xlu0 %667 }
  0x96   : > { %v760_v2 = vsel %vm756_vm4, %v2790_v16, %v668_v0 }
  0x97   : > { %v781_v3 = vsel %vm777_vm5, %v760_v2, %v739_v63 }
  0x98   : > { %2467 = vmatprep.mubr.msk.bf16.mxu0 %vm833_vm6, %v781_v3 }
  0x99   : > { %v670_v4 = vpop.permute.xlu0 %669  ;;  %v674_v6 = vpop.permute.xlu1 %673 }
  0x9a   : > { %v762_v5 = vsel %vm756_vm4, %v2794_v20, %v670_v4  ;;  %v766_v16 = vsel %vm756_vm4, %v2815_v41, %v674_v6 }
  0x9b   : > { %v783_v8 = vsel %vm777_vm5, %v762_v5, %v741_v1  ;;  %v3068_v5 = vstv %s2365_s14 }
  0x9c   : > { %2468 = vmatmul.mubr.msk.bf16.vlgmr.msra.gmra.mxu0 %vm833_vm6, %v783_v8  ;;  %vm1323_vm9 = vcmp.ge.s32.totalorder %v3068_v5, 0  ;;  %vm1333_vm10 = vcmp.lt.s32.totalorder %v3068_v5, 16 }
  0x9d   : > { %2510 = vmatpush3.bf16.msra.mxu0 %v1129_v7  ;;  %v745_v9 = vpop.permute.xlu1 %744  ;;  %vm3089_vm12 = vmand %vm1323_vm9, %vm1333_vm10 }
  0x9e   : > { %v672_v10 = vpop.permute.xlu0 %671  ;;  %v787_v14 = vsel %vm777_vm5, %v766_v16, %v745_v9 }
  0x9f   : > { %v764_v11 = vsel %vm756_vm4, %v2830_v62, %v672_v10  ;;  %v1314_v10 = vadd.s32 1, %v3068_v5 }
  0xa1   : > { %vm1324_vm7 = vcmp.ge.s32.totalorder %v1314_v10, 0  ;;  %vm1334_vm8 = vcmp.lt.s32.totalorder %v1314_v10, 16 }
  0xa2   : > { %v743_v12 = vpop.permute.xlu0 %742  ;;  %vm3084_vm11 = vmand %vm1324_vm7, %vm1334_vm8 }
  0xa3   : > { %v785_v13 = vsel %vm777_vm5, %v764_v11, %v743_v12  ;;  %v678_v20 = vpop.permute.xlu1 %677 }
  0xa4   : > { %2471 = vmatprep.mubr.msk.bf16.mxu0 %vm833_vm6, %v785_v13  ;;  %v770_v18 = vsel %vm756_vm4, %v2852_v23, %v678_v20 }
  0xa5   : > { %2472 = vmatmul.mubr.msk.bf16.gmra.mxu0 %vm833_vm6, %v787_v14 }
  0xa7   : > { %v676_v15 = vpop.permute.xlu0 %675  ;;  %v749_v17 = vpop.permute.xlu1 %748 }
  0xa8   : > { %v768_v41 = vsel %vm756_vm4, %v2863_v40, %v676_v15  ;;  %v791_v25 = vsel %vm777_vm5, %v770_v18, %v749_v17 }
  0xab   : > { %v747_v19 = vpop.permute.xlu0 %746  ;;  %v682_v62 = vpop.permute.xlu1 %681 }
  0xac   : > { %v789_v24 = vsel %vm777_vm5, %v768_v41, %v747_v19  ;;  %v774_v28 = vsel %vm756_vm4, %v2873_v55, %v682_v62  ;;  %v1316_v62 = vadd.s32 3, %v3068_v5 }
  0xad   : > { %2475 = vmatprep.mubr.msk.bf16.mxu0 %vm833_vm6, %v789_v24 }
  0xae   : > { %2476 = vmatmul.mubr.msk.bf16.gmra.mxu0 %vm833_vm6, %v791_v25  ;;  %vm1326_vm13 = vcmp.ge.s32.totalorder %v1316_v62, 0  ;;  %vm1336_vm14 = vcmp.lt.s32.totalorder %v1316_v62, 16 }
  0xaf   : > { %v753_v26 = vpop.permute.xlu1 %752  ;;  %vm3116_vm9 = vmand %vm1326_vm13, %vm1336_vm14 }
  0xb0   : > { %v680_v27 = vpop.permute.xlu0 %679  ;;  %v795_v31 = vsel %vm777_vm5, %v774_v28, %v753_v26 }
  0xb1   : > { %v772_v23 = vsel %vm756_vm4, %v2893_v21, %v680_v27 }
  0xb3   : > { %v755_v29 = vpop.permute.xlu1 %754 }
  0xb4   : > { %v751_v40 = vpop.permute.xlu0 %750 }
  0xb5   : > { %v793_v30 = vsel %vm777_vm5, %v772_v23, %v751_v40 }
  0xb6   : > { %2479 = vmatprep.mubr.msk.bf16.mxu0 %vm833_vm6, %v793_v30 }
  0xb7   : > { %2480 = vmatmul.mubr.msk.bf16.gmra.mxu0 %vm833_vm6, %v795_v31  ;;  %v820_v34 = vpop.permute.xlu1 %819 }
  0xb8   : > { %v684_v32 = vpop.permute.xlu0 %683 }
  0xb9   : > { %v776_v33 = vsel %vm756_vm4, %v2905_v39, %v684_v32  ;;  %v1315_v32 = vadd.s32 2, %v3068_v5 }
  0xba   : > { %v797_v55 = vsel %vm777_vm5, %v776_v33, %v755_v29 }
  0xbb   : > { %2483 = vmatprep.mubr.msk.bf16.mxu0 %vm833_vm6, %v797_v55  ;;  %v737_v37 = vpop.permute.xlu1 %736  ;;  %vm1325_vm15 = vcmp.ge.s32.totalorder %v1315_v32, 0  ;;  %vm1335_vm7 = vcmp.lt.s32.totalorder %v1315_v32, 16 }
  0xbc   : > { %v813_v35 = vpop.permute.xlu0 %812  ;;  %vm3132_vm13 = vmand %vm1325_vm15, %vm1335_vm7 }
  0xbd   : > { %v822_v21 = vsel %vm756_vm4, %v2915_v54, %v813_v35 }
  0xbe   : > { %v824_v36 = vsel %vm777_vm5, %v822_v21, %v820_v34 }
  0xbf   : > { %2484 = vmatmul.mubr.msk.bf16.gmra.mxu0 %vm833_vm6, %v824_v36  ;;  %v1114_v44 = vpop.permute.xlu1 %1113 }
  0xc0   : > { %2511 = vmatprep.mubr.msk.bf16.mxu0 %vm833_vm6, %v783_v8  ;;  %v666_v38 = vpop.permute.xlu0 %665 }
  0xc1   : > { %v758_v39 = vsel %vm756_vm4, %v2940_v22, %v666_v38  ;;  %v3098_v38 = vadd.s32 5, %v3068_v5 }
  0xc2   : > { %v779_v43 = vsel %vm777_vm5, %v758_v39, %v737_v37 }
  0xc3   : > { %2489 = vmatprep.mubr.msk.bf16.mxu1 %vm833_vm6, %v779_v43  ;;  %vm1328_vm8 = vcmp.ge.s32.totalorder %v3098_v38, 0  ;;  %vm1338_vm10 = vcmp.lt.s32.totalorder %v3098_v38, 16 }
  0xc4   : > { %2490 = vmatmul.mubr.msk.bf16.vlgmr.msra.gmra.mxu1 %vm833_vm6, %v781_v3  ;;  %v1107_v54 = vpop.permute.xlu0 %1106  ;;  %vm3178_vm7 = vmand %vm1328_vm8, %vm1338_vm10 }
  0xc5   : > { %2493 = vmatprep.mubr.msk.bf16.mxu1 %vm833_vm6, %v783_v8  ;;  %v1116_v22 = vsel %vm756_vm4, %v2956_v42, %v1107_v54  ;;  %v1765_v42 = vsel %vm854_vm3, %v1747_v51, 0 }
  0xc6   : > { %v1118_v45 = vsel %vm777_vm5, %v1116_v22, %v1114_v44  ;;  %2532 = vmatpush3.bf16.msra.mxu1 %v1765_v42 }
  0xc7   : > { %2512 = vmatmul.mubr.msk.bf16.vlgmr.msra.gmra.mxu0 %vm833_vm6, %v785_v13 }
  0xc8   : > { %2515 = vmatprep.mubr.msk.bf16.mxu0 %vm833_vm6, %v787_v14 }
  0xcc   : > { %2494 = vmatmul.mubr.msk.bf16.gmra.mxu1 %vm833_vm6, %v785_v13  ;;  %v3078_v13 = vld [vmem:[%s3609_s3] ss:$0 sm:$0xff] }
  0xcd   : > { %2497 = vmatprep.mubr.msk.bf16.mxu1 %vm833_vm6, %v787_v14 }
  0xcf   : > { %2516 = vmatmul.mubr.msk.bf16.gmra.mxu0 %vm833_vm6, %v789_v24 }
  0xd0   : > { %2519 = vmatprep.mubr.msk.bf16.mxu0 %vm833_vm6, %v791_v25 }
  0xd4   : > { %2498 = vmatmul.mubr.msk.bf16.gmra.mxu1 %vm833_vm6, %v789_v24 }
  0xd5   : > { %2501 = vmatprep.mubr.msk.bf16.mxu1 %vm833_vm6, %v791_v25 }
  0xd7   : > { %2520 = vmatmul.mubr.msk.bf16.gmra.mxu0 %vm833_vm6, %v793_v30 }
  0xd8   : > { %2523 = vmatprep.mubr.msk.bf16.mxu0 %vm833_vm6, %v795_v31 }
  0xdc   : > { %2502 = vmatmul.mubr.msk.bf16.gmra.mxu1 %vm833_vm6, %v793_v30 }
  0xdd   : > { %2505 = vmatprep.mubr.msk.bf16.mxu1 %vm833_vm6, %v795_v31 }
  0xdf   : > { %2524 = vmatmul.mubr.msk.bf16.gmra.mxu0 %vm833_vm6, %v797_v55 }
  0xe0   : > { %2527 = vmatprep.mubr.msk.bf16.mxu0 %vm833_vm6, %v824_v36 }
  0xe4   : > { %2506 = vmatmul.mubr.msk.bf16.gmra.mxu1 %vm833_vm6, %v797_v55 }
  0xe7   : > { %2528 = vmatmul.mubr.msk.bf16.gmra.mxu0 %vm833_vm6, %v1118_v45 }
 0x15c   : > { %v2469_v46 = vpop.f32.mrf.mxu0 }
 0x15e   : > { %v892_v47 = vpop.f32.mrf.mxu0 }
 0x160   : > { %v2470_v48 = vpop.f32.mrf.mxu0 }
 0x162   : > { %v895_v50 = vpop.f32.mrf.mxu0 }
 0x165   : > { %v2473_v52 = vpop.f32.mrf.mxu0 }
 0x167   : > { %v908_v53 = vpop.f32.mrf.mxu0 }
 0x169   : > { %v2474_v56 = vpop.f32.mrf.mxu0 }
 0x16b   : > { %v3045_v57 = vpop.f32.mrf.mxu0 }
 0x16e   : > { %v3047_v58 = vpop.f32.mrf.mxu0 }
 0x170   : > { %v3049_v59 = vpop.f32.mrf.mxu0 }
 0x172   : > { %v3051_v60 = vpop.f32.mrf.mxu0 }
 0x174   : > { %v3053_v61 = vpop.f32.mrf.mxu0 }
 0x177   : > { %v3055_v63 = vpop.f32.mrf.mxu0 }
 0x179   : > { %v3057_v0 = vpop.f32.mrf.mxu0 }
 0x17b   : > { %v3059_v1 = vpop.f32.mrf.mxu0 }
 0x17d   : > { %v3061_v2 = vpop.f32.mrf.mxu0 }
 0x17f   : > { %v3063_v3 = vpop.f32.mrf.mxu0 }
 0x181   : > { %v3066_v4 = vpop.f32.mrf.mxu0 }
 0x183   : > { %v3070_v6 = vpop.f32.mrf.mxu0 }
 0x184   : > { %v2491_v7 = vpop.f32.mrf.mxu1 }
 0x185   : > { %v1024_v8 = vadd.f32 %v2491_v7, %v2469_v46  ;;  %v3072_v9 = vpop.f32.mrf.mxu0 }
 0x186   : > { %v1015_v16 = vpop.f32.mrf.mxu1 }
 0x187   : > { %v1016_v11 = vadd.f32 %v1015_v16, %v892_v47  ;;  %v2513_v12 = vpop.f32.mrf.mxu0  ;;  %v3104_v47 = vadd.s32 4, %v3068_v5 }
 0x188   : > { %v1246_v20 = vadd.f32 %v2513_v12, %v1024_v8  ;;  %v2492_v14 = vpop.f32.mrf.mxu1 }
 0x189   : > { %v1027_v15 = vadd.f32 %v2492_v14, %v2470_v48  ;;  %v1165_v17 = vpop.f32.mrf.mxu0 }
 0x18a   : > { %v1273_v18 = vadd.f32 %v3078_v13, %v1246_v20  ;;  %v1244_v41 = vadd.f32 %v1165_v17, %v1016_v11  ;;  %v1018_v19 = vpop.f32.mrf.mxu1 }
 0x18b   : > { %v1019_v24 = vadd.f32 %v1018_v19, %v895_v50  ;;  %v2514_v25 = vpop.f32.mrf.mxu0 }
 0x18c   : > { %v1293_v26 = vmax.f32 %v1273_v18, 0.0  ;;  %v1271_v28 = vadd.f32 %v3078_v13, %v1244_v41  ;;  %v1247_v29 = vadd.f32 %v2514_v25, %v1027_v15  ;;  %v2495_v23 = vpop.f32.mrf.mxu1 }
 0x18d   : > { %v1040_v30 = vadd.f32 %v2495_v23, %v2473_v52  ;;  %v1168_v31 = vpop.f32.mrf.mxu0 }
 0x18e   : > { %v1291_v33 = vmax.f32 %v1271_v28, 0.0  ;;  %v1274_v34 = vadd.f32 %v3078_v13, %v1247_v29  ;;  %v1245_v55 = vadd.f32 %v1168_v31, %v1019_v24  ;;  %v1031_v35 = vpop.f32.mrf.mxu1  ;;  %v1375_v21 = vsel %vm3084_vm11, %v1293_v26, 0.0 }
 0x18f   : > { %v1032_v36 = vadd.f32 %v1031_v35, %v908_v53  ;;  %v2517_v37 = vpop.f32.mrf.mxu0  ;;  %v1416_v52 = vrot.slane %v1375_v21, 7  ;;  %v3126_v24 = vadd.s32 7, %v3068_v5  ;;  %v3138_v29 = vadd.s32 6, %v3068_v5 }
 0x190   : > { %v1373_v39 = vsel %vm3089_vm12, %v1291_v33, 0.0  ;;  %v1294_v43 = vmax.f32 %v1274_v34, 0.0  ;;  %v1272_v54 = vadd.f32 %v3078_v13, %v1245_v55  ;;  %v1250_v22 = vadd.f32 %v2517_v37, %v1040_v30  ;;  %v2496_v44 = vpop.f32.mrf.mxu1 }
 0x191   : > { %v1043_v45 = vadd.f32 %v2496_v44, %v2474_v56  ;;  %v1181_v46 = vpop.f32.mrf.mxu0  ;;  %v1413_v53 = vrot.slane %v1373_v39, 7  ;;  %vm1330_vm14 = vcmp.ge.s32.totalorder %v3126_v24, 0  ;;  %vm1340_vm15 = vcmp.lt.s32.totalorder %v3126_v24, 16 }
 0x192   : > { %v1376_v48 = vsel %vm3084_vm11, %v1294_v43, 0.0  ;;  %v1292_v49 = vmax.f32 %v1272_v54, 0.0  ;;  %v1277_v50 = vadd.f32 %v3078_v13, %v1250_v22  ;;  %v1248_v51 = vadd.f32 %v1181_v46, %v1032_v36  ;;  %v1034_v42 = vpop.f32.mrf.mxu1 }
 0x193   : > { %v1417_v7 = vrot.slane %v1376_v48, 7  ;;  %v1035_v8 = vadd.f32 %v1034_v42, %v3045_v57  ;;  %v2518_v56 = vpop.f32.mrf.mxu0  ;;  %vm1327_vm11 = vcmp.ge.s32.totalorder %v3104_v47, 0  ;;  %v1473_v62 = vsel %vm423_vm0, 0.0, %v1413_v53 }
 0x194   : > { %v1374_v10 = vsel %vm3089_vm12, %v1292_v49, 0.0  ;;  %v1297_v16 = vmax.f32 %v1277_v50, 0.0  ;;  %v1275_v11 = vadd.f32 %v3078_v13, %v1248_v51  ;;  %v1251_v12 = vadd.f32 %v2518_v56, %v1043_v45  ;;  %v2499_v20 = vpop.f32.mrf.mxu1 }
 0x195   : > { %v1414_v14 = vrot.slane %v1374_v10, 7  ;;  %v1184_v17 = vpop.f32.mrf.mxu0  ;;  %vm1337_vm12 = vcmp.lt.s32.totalorder %v3104_v47, 16  ;;  %v1418_v57 = vsel %vm423_vm0, %v1416_v52, %v1417_v7  ;;  %v1056_v41 = vadd.f32 %v2499_v20, %v3047_v58 }
 0x196   : > { %v1295_v18 = vmax.f32 %v1275_v11, 0.0  ;;  %v1047_v19 = vpop.f32.mrf.mxu1  ;;  %v1278_v27 = vadd.f32 %v3078_v13, %v1251_v12  ;;  %v1474_v58 = vsel %vm423_vm0, 0.0, %v1416_v52  ;;  %v1379_v40 = vsel %vm3116_vm9, %v1297_v16, 0.0 }
 0x197   : > { %v1415_v25 = vsel %vm423_vm0, %v1413_v53, %v1414_v14  ;;  %v2521_v28 = vpop.f32.mrf.mxu0  ;;  %v1249_v30 = vadd.f32 %v1184_v17, %v1035_v8  ;;  %v1484_v32 = vsel %vm423_vm0, %v1417_v7, 0.0  ;;  %v3146_v33 = vpack.c.bf16 %v1418_v57, %v1474_v58 }
 0x198   : > { %v3141_v23 = vpack.c.bf16 %v1415_v25, %v1473_v62  ;;  %v2500_v31 = vpop.f32.mrf.mxu1  ;;  %v1298_v34 = vmax.f32 %v1278_v27, 0.0  ;;  %v1048_v55 = vadd.f32 %v1047_v19, %v3049_v59  ;;  %v1377_v21 = vsel %vm3132_vm13, %v1295_v18, 0.0 }
 0x199   : > { %v1197_v35 = vpop.f32.mrf.mxu0  ;;  %v1276_v36 = vadd.f32 %v3078_v13, %v1249_v30  ;;  %v1254_v37 = vadd.f32 %v2521_v28, %v1056_v41  ;;  %v1059_v39 = vadd.f32 %v2500_v31, %v3051_v60  ;;  %v1422_v54 = vrot.slane %v1379_v40, 7 }
 0x19a   : > { %v1050_v43 = vpop.f32.mrf.mxu1  ;;  %v1380_v22 = vsel %vm3116_vm9, %v1298_v34, 0.0  ;;  %v1252_v44 = vadd.f32 %v1197_v35, %v1048_v55  ;;  %v3159_v60 = vpack.c.bf16 %v1484_v32, %v1484_v32  ;;  %v1419_v42 = vrot.slane %v1377_v21, 7  ;;  %vm3189_vm9 = vmand %vm1327_vm11, %vm1337_vm12 }
 0x19b   : > { %v1051_v45 = vadd.f32 %v1050_v43, %v3053_v61  ;;  %v2522_v46 = vpop.f32.mrf.mxu0  ;;  %v1423_v48 = vrot.slane %v1380_v22, 7  ;;  %v1296_v59 = vmax.f32 %v1276_v36, 0.0  ;;  %v1281_v49 = vadd.f32 %v3078_v13, %v1254_v37  ;;  %vm3222_vm11 = vmand %vm1330_vm14, %vm1340_vm15 }
 0x19c   : > { %v1255_v50 = vadd.f32 %v2522_v46, %v1059_v39  ;;  %v2503_v51 = vpop.f32.mrf.mxu1  ;;  %v1279_v52 = vadd.f32 %v3078_v13, %v1252_v44  ;;  %v3163_v7 = vadd.s32 9, %v3068_v5  ;;  %v3166_v61 = vsel %vm423_vm0, %v1414_v14, 0.0 }
 0x19d   : > { %v1200_v53 = vpop.f32.mrf.mxu0  ;;  %v1378_v8 = vsel %vm3132_vm13, %v1296_v59, 0.0  ;;  %v1301_v56 = vmax.f32 %v1281_v49, 0.0  ;;  %v3171_v16 = vadd.s32 8, %v3068_v5  ;;  %v1424_v11 = vsel %vm423_vm0, %v1422_v54, %v1423_v48 }
 0x19e   : > { %v1063_v10 = vpop.f32.mrf.mxu1  ;;  %v1299_v20 = vmax.f32 %v1279_v52, 0.0  ;;  %v1072_v14 = vadd.f32 %v2503_v51, %v3055_v63  ;;  %v1528_v17 = vshll.u32 %v3146_v33, 16  ;;  %v1476_v57 = vsel %vm423_vm0, 0.0, %v1422_v54 }
 0x19f   : > { %v2525_v15 = vpop.f32.mrf.mxu0  ;;  %v1420_v5 = vrot.slane %v1378_v8, 7  ;;  %v1282_v38 = vadd.f32 %v3078_v13, %v1255_v50  ;;  %v1253_v41 = vadd.f32 %v1200_v53, %v1051_v45  ;;  %v1475_v63 = vsel %vm423_vm0, 0.0, %v1419_v42  ;;  %v3229_v53 = vld [vmem:[%s3610_s4 + $0xc] sm:$0x3f]  }
 0x1a0   : > { %v2504_v19 = vpop.f32.mrf.mxu1  ;;  %v1486_v62 = vsel %vm423_vm0, %v1423_v48, 0.0  ;;  %v1526_v25 = vshrl.u32 %v3146_v33, 16  ;;  %v1533_v26 = vshll.u32 %v3159_v60, 16  ;;  %vm1329_vm8 = vcmp.ge.s32.totalorder %v3138_v29, 0  ;;  %2590 = vmatprep.subr.msk.bf16.mxu0 %vm854_vm3, %v3229_v53 }
 0x1a1   : > { %v1213_v27 = vpop.f32.mrf.mxu0  ;;  %vm1339_vm10 = vcmp.lt.s32.totalorder %v3138_v29, 16  ;;  %v3200_v47 = vpack.c.bf16 %v1424_v11, %v1476_v57  ;;  %v1383_v28 = vsel %vm3178_vm7, %v1301_v56, 0.0  ;;  %v1302_v58 = vmax.f32 %v1282_v38, 0.0 }
 0x1a2   : > { %v1064_v40 = vadd.f32 %v1063_v10, %v3057_v0  ;;  %v1066_v30 = vpop.f32.mrf.mxu1  ;;  %v1381_v31 = vsel %vm3189_vm9, %v1299_v20, 0.0  ;;  %v1280_v32 = vadd.f32 %v3078_v13, %v1253_v41  ;;  %v1258_v34 = vadd.f32 %v2525_v15, %v1072_v14  ;;  %vm3256_vm12 = vmand %vm1329_vm8, %vm1339_vm10 }
 0x1a3   : > { %v1530_v55 = vrot.slane %v1528_v17, 1  ;;  %v2526_v35 = vpop.f32.mrf.mxu0  ;;  %v3208_v21 = vpack.c.bf16 %v1486_v62, %v1486_v62  ;;  %v1421_v36 = vsel %vm423_vm0, %v1419_v42, %v1420_v5  ;;  %v1384_v37 = vsel %vm3178_vm7, %v1302_v58, 0.0 }
 0x1a4   : > { %v1075_v39 = vadd.f32 %v2504_v19, %v3059_v1  ;;  %v1428_v43 = vrot.slane %v1383_v28, 7  ;;  %v1300_v0 = vmax.f32 %v1280_v32, 0.0  ;;  %v1285_v54 = vadd.f32 %v3078_v13, %v1258_v34  ;;  %v2507_v44 = vpop.f32.mrf.mxu1 }
 0x1a5   : > { %v1531_v22 = vor.u32 %v1530_v55, %v1526_v25  ;;  %v1216_v45 = vpop.f32.mrf.mxu0  ;;  %v1425_v46 = vrot.slane %v1381_v31, 7  ;;  %v1535_v48 = vrot.slane %v1533_v26, 1  ;;  %v1256_v59 = vadd.f32 %v1213_v27, %v1064_v40 }
 0x1a6   : > { %v1259_v49 = vadd.f32 %v2526_v35, %v1075_v39  ;;  %v1485_v50 = vsel %vm423_vm0, %v1420_v5, 0.0  ;;  %v1429_v51 = vrot.slane %v1384_v37, 7  ;;  %v1382_v42 = vsel %vm3189_vm9, %v1300_v0, 0.0  ;;  %v1079_v15 = vpop.f32.mrf.mxu1 }
 0x1a7   : > { %v1305_v52 = vmax.f32 %v1285_v54, 0.0  ;;  %v1426_v8 = vrot.slane %v1382_v42, 7  ;;  %v1536_v56 = vsel %vm544_vm2, %v1531_v22, %v1535_v48  ;;  %v1067_v10 = vadd.f32 %v1066_v30, %v3061_v2  ;;  %v2529_v17 = vpop.f32.mrf.mxu0 }
 0x1a8   : > { %v1644_v11 = vrot.slane %v3146_v33, 1  ;;  %v3234_v12 = vpack.c.bf16 %v1421_v36, %v1475_v63  ;;  %1611 = vrot.lane.b32.xlu0 %v1536_v56, %s2697_s18  ;;  %v1283_v24 = vadd.f32 %v3078_v13, %v1256_v59  ;;  %v1286_v20 = vadd.f32 %v3078_v13, %v1259_v49  ;;  %v2508_v30 = vpop.f32.mrf.mxu1 }
 0x1a9   : > { %v1645_v14 = vrot.slane %v3159_v60, 1  ;;  %v3242_v57 = vpack.c.bf16 %v1485_v50, %v1485_v50  ;;  %v1478_v2 = vsel %vm423_vm0, 0.0, %v1428_v43  ;;  %v1477_v5 = vsel %vm423_vm0, 0.0, %v1425_v46  ;;  %v1229_v31 = vpop.f32.mrf.mxu0 }
 0x1aa   : > { %v1387_v18 = vsel %vm3222_vm11, %v1305_v52, 0.0  ;;  %v1430_v38 = vsel %vm423_vm0, %v1428_v43, %v1429_v51  ;;  %v1488_v41 = vsel %vm423_vm0, %v1429_v51, 0.0  ;;  %v1303_v19 = vmax.f32 %v1283_v24, 0.0  ;;  %v1082_v59 = vpop.f32.mrf.mxu1 }
 0x1ab   : > { %v1306_v60 = vmax.f32 %v1286_v20, 0.0  ;;  %v1427_v63 = vsel %vm423_vm0, %v1425_v46, %v1426_v8  ;;  %v1487_v62 = vsel %vm423_vm0, %v1426_v8, 0.0  ;;  %v1646_v26 = vsel %vm705_vm1, %v1644_v11, %v1645_v14  ;;  %v2530_v49 = vpop.f32.mrf.mxu0 }
 0x1ac   : > { %v1257_v27 = vadd.f32 %v1216_v45, %v1067_v10  ;;  %vm1331_vm13 = vcmp.ge.s32.totalorder %v3171_v16, 0  ;;  %vm1341_vm14 = vcmp.lt.s32.totalorder %v3171_v16, 16  ;;  %v1434_v28 = vrot.slane %v1387_v18, 7  ;;  %1667 = vrot.lane.b32.xlu0 %v1646_v26, %s2696_s16 }
 0x1ad   : > { %v1388_v58 = vsel %vm3222_vm11, %v1306_v60, 0.0  ;;  %v1088_v40 = vadd.f32 %v2507_v44, %v3063_v3  ;;  %v1552_v29 = vshll.u32 %v3200_v47, 16  ;;  %v3268_v32 = vpack.c.bf16 %v1430_v38, %v1478_v2  ;;  %v3287_v44 = vld [vmem:[%s3610_s4] sm:$0x3f]   ;;  %vm3314_vm9 = vmand %vm1331_vm13, %vm1341_vm14 }
 0x1ae   : > { %v3270_v34 = vpack.c.bf16 %v1488_v41, %v1488_v41  ;;  %v1284_v55 = vadd.f32 %v3078_v13, %v1257_v27  ;;  %v1557_v35 = vshll.u32 %v3208_v21, 16  ;;  %v1385_v36 = vsel %vm3256_vm12, %v1303_v19, 0.0  ;;  %2589 = vmatprep.subr.msk.bf16.mxu1 %vm854_vm3, %v3287_v44 }
 0x1af   : > { %v1080_v37 = vadd.f32 %v1079_v15, %v3066_v4  ;;  %v1550_v39 = vshrl.u32 %v3200_v47, 16  ;;  %v1554_v3 = vrot.slane %v1552_v29, 1  ;;  %vm1332_vm15 = vcmp.ge.s32.totalorder %v3163_v7, 0 }
 0x1b0   : > { %vm1342_vm7 = vcmp.lt.s32.totalorder %v3163_v7, 16  ;;  %v3280_v43 = vpack.c.bf16 %v1427_v63, %v1477_v5  ;;  %v3282_v0 = vpack.c.bf16 %v1487_v62, %v1487_v62  ;;  %v1435_v54 = vrot.slane %v1388_v58, 7 }
 0x1b1   : > { %v1304_v22 = vmax.f32 %v1284_v55, 0.0  ;;  %v1480_v4 = vsel %vm423_vm0, 0.0, %v1434_v28  ;;  %v1555_v45 = vor.u32 %v1554_v3, %v1550_v39  ;;  %v1559_v46 = vrot.slane %v1557_v35, 1  ;;  %vm3333_vm8 = vmand %vm1332_vm15, %vm1342_vm7 }
 0x1b2   : > { %v1262_v48 = vadd.f32 %v2529_v17, %v1088_v40  ;;  %v1431_v50 = vrot.slane %v1385_v36, 7  ;;  %v1540_v42 = vshll.u32 %v3234_v12, 16  ;;  %v1545_v52 = vshll.u32 %v3242_v57, 16 }
 0x1b3   : > { %v1386_v51 = vsel %vm3256_vm12, %v1304_v22, 0.0  ;;  %v1560_v1 = vsel %vm544_vm2, %v1555_v45, %v1559_v46  ;;  %v1091_v8 = vadd.f32 %v2508_v30, %v3070_v6  ;;  %v1538_v56 = vshrl.u32 %v3234_v12, 16  ;;  %v1232_v6 = vpop.f32.mrf.mxu0 }
 0x1b4   : > { %v1260_v10 = vadd.f32 %v1229_v31, %v1080_v37  ;;  %v1436_v11 = vsel %vm423_vm0, %v1434_v28, %v1435_v54  ;;  %1615 = vrot.lane.b32.xlu0 %v1560_v1, %s2697_s18  ;;  %v1542_v24 = vrot.slane %v1540_v42, 1  ;;  %v1083_v20 = vadd.f32 %v1082_v59, %v3072_v9 }
 0x1b5   : > { %v1650_v14 = vrot.slane %v3200_v47, 1  ;;  %v1432_v15 = vrot.slane %v1386_v51, 7  ;;  %v1289_v17 = vadd.f32 %v3078_v13, %v1262_v48  ;;  %v1651_v5 = vrot.slane %v3208_v21, 1 }
 0x1b6   : > { %v1287_v2 = vadd.f32 %v3078_v13, %v1260_v10  ;;  %v1479_v18 = vsel %vm423_vm0, 0.0, %v1431_v50  ;;  %v1490_v38 = vsel %vm423_vm0, %v1435_v54, 0.0  ;;  %v1543_v41 = vor.u32 %v1542_v24, %v1538_v56 }
 0x1b7   : > { %v1547_v19 = vrot.slane %v1545_v52, 1  ;;  %v3308_v60 = vpack.c.bf16 %v1436_v11, %v1480_v4  ;;  %v1652_v21 = vsel %vm705_vm1, %v1650_v14, %v1651_v5  ;;  %v1263_v62 = vadd.f32 %v2530_v49, %v1091_v8 }
 0x1b8   : > { %v1307_v63 = vmax.f32 %v1287_v2, 0.0  ;;  %1671 = vrot.lane.b32.xlu0 %v1652_v21, %s2696_s16  ;;  %v1647_v26 = vrot.slane %v3234_v12, 1  ;;  %v1648_v27 = vrot.slane %v3242_v57, 1  ;;  %v1261_v28 = vadd.f32 %v1232_v6, %v1083_v20 }
 0x1b9   : > { %v1548_v25 = vsel %vm544_vm2, %v1543_v41, %v1547_v19  ;;  %v3323_v58 = vpack.c.bf16 %v1490_v38, %v1490_v38  ;;  %v1433_v16 = vsel %vm423_vm0, %v1431_v50, %v1432_v15  ;;  %v1309_v40 = vmax.f32 %v1289_v17, 0.0 }
 0x1ba   : > { %1613 = vrot.lane.b32.xlu1 %v1548_v25, %s2697_s18  ;;  %v1290_v29 = vadd.f32 %v3078_v13, %v1263_v62  ;;  %v1489_v30 = vsel %vm423_vm0, %v1432_v15, 0.0  ;;  %v1389_v57 = vsel %vm3314_vm9, %v1307_v63, 0.0  ;;  %v1288_v55 = vadd.f32 %v3078_v13, %v1261_v28 }
 0x1bb   : > { %v1576_v35 = vshll.u32 %v3268_v32, 16  ;;  %v1574_v37 = vshrl.u32 %v3268_v32, 16  ;;  %v1581_v39 = vshll.u32 %v3270_v34, 16  ;;  %v1564_v3 = vshll.u32 %v3280_v43, 16 }
 0x1bc   : > { %v1310_v36 = vmax.f32 %v1290_v29, 0.0  ;;  %v1649_v7 = vsel %vm705_vm1, %v1647_v26, %v1648_v27  ;;  %v1308_v54 = vmax.f32 %v1288_v55, 0.0  ;;  %v1569_v4 = vshll.u32 %v3282_v0, 16 }
 0x1bd   : > { %v1578_v22 = vrot.slane %v1576_v35, 1  ;;  %v1391_v45 = vsel %vm3333_vm8, %v1309_v40, 0.0  ;;  %v1437_v46 = vrot.slane %v1389_v57, 7  ;;  %v1562_v13 = vshrl.u32 %v3280_v43, 16 }
 0x1be   : > { %1669 = vrot.lane.b32.xlu1 %v1649_v7, %s2696_s16  ;;  %v1566_v48 = vrot.slane %v1564_v3, 1  ;;  %v1392_v59 = vsel %vm3333_vm8, %v1310_v36, 0.0  ;;  %v1390_v49 = vsel %vm3314_vm9, %v1308_v54, 0.0  ;;  %v1583_v51 = vrot.slane %v1581_v39, 1 }
 0x1bf   : > { %v1579_v50 = vor.u32 %v1578_v22, %v1574_v37  ;;  %v3354_v42 = vpack.c.bf16 %v1433_v16, %v1479_v18  ;;  %v3356_v52 = vpack.c.bf16 %v1489_v30, %v1489_v30  ;;  %v1438_v1 = vrot.slane %v1390_v49, 7 }
 0x1c0   : > { %v1567_v8 = vor.u32 %v1566_v48, %v1562_v13  ;;  %v1571_v10 = vrot.slane %v1569_v4, 1  ;;  %v1656_v11 = vrot.slane %v3268_v32, 1  ;;  %v1657_v24 = vrot.slane %v3270_v34, 1 }
 0x1c1   : > { %v1584_v56 = vsel %vm544_vm2, %v1579_v50, %v1583_v51  ;;  %v1440_v20 = vrot.slane %v1391_v45, 7  ;;  %v1441_v14 = vrot.slane %v1392_v59, 7  ;;  %v1439_v15 = vsel %vm423_vm0, %v1437_v46, %v1438_v1 }
 0x1c2   : > { %v1491_v17 = vsel %vm423_vm0, %v1438_v1, 0.0  ;;  %1619 = vrot.lane.b32.xlu0 %v1584_v56, %s2697_s18  ;;  %v1481_v2 = vsel %vm423_vm0, 0.0, %v1437_v46  ;;  %v1572_v5 = vsel %vm544_vm2, %v1567_v8, %v1571_v10  ;;  %v1653_v6 = vrot.slane %v3280_v43, 1 }
 0x1c3   : > { %v1654_v18 = vrot.slane %v3282_v0, 1  ;;  %v3368_v38 = vpack.c.bf16 %v1439_v15, %v1481_v2  ;;  %v3370_v41 = vpack.c.bf16 %v1491_v17, %v1491_v17  ;;  %1617 = vrot.lane.b32.xlu1 %v1572_v5, %s2697_s18  ;;  %v1600_v34 = vshll.u32 %v3308_v60, 16 }
 0x1c4   : > { %v1605_v19 = vshll.u32 %v3323_v58, 16  ;;  %v1658_v63 = vsel %vm705_vm1, %v1656_v11, %v1657_v24  ;;  %v1588_v9 = vshll.u32 %v3354_v42, 16  ;;  %v1593_v21 = vshll.u32 %v3356_v52, 16 }
 0x1c5   : > { %v3380_v62 = vpack.c.bf16 %v3166_v61, %v3166_v61  ;;  %v1442_v0 = vsel %vm423_vm0, %v1440_v20, %v1441_v14  ;;  %v1598_v25 = vshrl.u32 %v3308_v60, 16  ;;  %v1602_v26 = vrot.slane %v1600_v34, 1 }
 0x1c6   : > { %1675 = vrot.lane.b32.xlu0 %v1658_v63, %s2696_s16  ;;  %v1482_v27 = vsel %vm423_vm0, 0.0, %v1440_v20  ;;  %v1655_v28 = vsel %vm705_vm1, %v1653_v6, %v1654_v18  ;;  %v1586_v16 = vshrl.u32 %v3354_v42, 16  ;;  %v1590_v40 = vrot.slane %v1588_v9, 1 }
 0x1c7   : > { %1673 = vrot.lane.b32.xlu1 %v1655_v28, %s2696_s16  ;;  %v1603_v29 = vor.u32 %v1602_v26, %v1598_v25  ;;  %v1607_v30 = vrot.slane %v1605_v19, 1  ;;  %v1718_v61 = vshll.u32 %v3368_v38, 16  ;;  %v1723_v31 = vshll.u32 %v3370_v41, 16 }
 0x1c8   : > { %v1492_v57 = vsel %vm423_vm0, %v1441_v14, 0.0  ;;  %v3392_v55 = vpack.c.bf16 %v1442_v0, %v1482_v27  ;;  %v1591_v35 = vor.u32 %v1590_v40, %v1586_v16  ;;  %v1595_v36 = vrot.slane %v1593_v21, 1 }
 0x1c9   : > { %v1608_v37 = vsel %vm544_vm2, %v1603_v29, %v1607_v30  ;;  %v1716_v39 = vshrl.u32 %v3368_v38, 16  ;;  %v1720_v3 = vrot.slane %v1718_v61, 1  ;;  %v1659_v54 = vrot.slane %v3354_v42, 1 }
 0x1ca   : > { %1623 = vrot.lane.b32.xlu0 %v1608_v37, %s2697_s18  ;;  %v1596_v7 = vsel %vm544_vm2, %v1591_v35, %v1595_v36  ;;  %v1660_v22 = vrot.slane %v3356_v52, 1  ;;  %v1516_v4 = vshll.u32 %v3141_v23, 16  ;;  %v1512_v45 = vpack.c.bf16 %v1492_v57, %v1492_v57 }
 0x1cb   : > { %1621 = vrot.lane.b32.xlu1 %v1596_v7, %s2697_s18  ;;  %v1721_v46 = vor.u32 %v1720_v3, %v1716_v39  ;;  %v1725_v13 = vrot.slane %v1723_v31, 1  ;;  %v1521_v48 = vshll.u32 %v3380_v62, 16  ;;  %v1514_v59 = vshrl.u32 %v3141_v23, 16 }
 0x1cc   : > { %v1518_v49 = vrot.slane %v1516_v4, 1  ;;  %v1974_v50 = vshll.u32 %v3392_v55, 16  ;;  %v1662_v51 = vrot.slane %v3308_v60, 1  ;;  %v1663_v1 = vrot.slane %v3323_v58, 1 }
 0x1cd   : > { %v1726_v52 = vsel %vm544_vm2, %v1721_v46, %v1725_v13  ;;  %v1661_v8 = vsel %vm705_vm1, %v1659_v54, %v1660_v22  ;;  %v2006_v11 = vsel %vm854_vm3, %v3229_v53, 0  ;;  %v1523_v24 = vrot.slane %v1521_v48, 1 }
 0x1ce   : > { %1727 = vrot.lane.b32.xlu0 %v1726_v52, %s2697_s18  ;;  %v1519_v56 = vor.u32 %v1518_v49, %v1514_v59  ;;  %v1976_v10 = vrot.slane %v1974_v50, 1  ;;  %v1972_v20 = vshrl.u32 %v3392_v55, 16  ;;  %v1979_v14 = vshll.u32 %v1512_v45, 16  ;;  %2568 = vmatpush3.bf16.msra.mxu0 %v2006_v11 }
 0x1cf   : > { %1677 = vrot.lane.b32.xlu1 %v1661_v8, %s2696_s16  ;;  %v1664_v17 = vsel %vm705_vm1, %v1662_v51, %v1663_v1  ;;  %v1731_v2 = vrot.slane %v3368_v38, 1  ;;  %v1732_v5 = vrot.slane %v3370_v41, 1  ;;  %v1641_v34 = vrot.slane %v3141_v23, 1 }
 0x1d0   : > { %v1524_v58 = vsel %vm544_vm2, %v1519_v56, %v1523_v24  ;;  %v1977_v15 = vor.u32 %v1976_v10, %v1972_v20  ;;  %v1981_v53 = vrot.slane %v1979_v14, 1  ;;  %v1642_v19 = vrot.slane %v3380_v62, 1 }
 0x1d1   : > { %v1733_v18 = vsel %vm705_vm1, %v1731_v2, %v1732_v5  ;;  %v1987_v41 = vrot.slane %v3392_v55, 1  ;;  %v1988_v9 = vrot.slane %v1512_v45, 1  ;;  %v1872_v30 = vsel %vm854_vm3, %v3287_v44, 0 }
 0x1d2   : > { %1609 = vrot.lane.b32.xlu0 %v1524_v58, %s2697_s18  ;;  %v1982_v6 = vsel %vm544_vm2, %v1977_v15, %v1981_v53  ;;  %v1643_v63 = vsel %vm705_vm1, %v1641_v34, %v1642_v19 }
 0x1d3   : > { %1679 = vrot.lane.b32.xlu1 %v1664_v17, %s2696_s16  ;;  %v1989_v21 = vsel %vm705_vm1, %v1987_v41, %v1988_v9 }
 0x1d6   : > { %1983 = vrot.lane.b32.xlu0 %v1982_v6, %s2697_s18  ;;  %s2328_s18 = sshll.u32 %s3644_s22, 5 }
 0x1d7   : > { %1734 = vrot.lane.b32.xlu1 %v1733_v18, %s2696_s16 }
 0x1db   : > { %1665 = vrot.lane.b32.xlu1 %v1643_v63, %s2696_s16 }
 0x1df   : > { %1990 = vrot.lane.b32.xlu1 %v1989_v21, %s2696_s16  ;;  %s2327_s16 = sshll.u32 %s3648_s28, 1 }
 0x1e0   : > { %s370_s7 = sadd.s32 %s2328_s18, %s2327_s16 }
 0x1e1   : > { %s2329_s10 = sshll.u32 %s370_s7, 3 }
 0x1e2   : > { %s3518_s11 = scalar_lea.vmem %s3612_s6, %s2329_s10 }
 0x21a   : > { %v1612_v0 = vpop.permute.xlu0 %1611 }
 0x21b   : > { %v1684_v25 = vsel %vm756_vm4, %v3146_v33, %v1612_v0 }
 0x21e   : > { %v1668_v62 = vpop.permute.xlu0 %1667 }
 0x21f   : > { %v1700_v26 = vsel %vm777_vm5, %v1684_v25, %v1668_v62  ;;  %v3511_v62 = vld [vmem:[%s3611_s5] ss:$0 sm:$0xff] }
 0x220   : > { %2533 = vmatprep.mubr.msk.bf16.mxu1 %vm833_vm6, %v1700_v26 }
 0x226   : > { %v1616_v27 = vpop.permute.xlu0 %1615 }
 0x227   : > { %v1688_v61 = vsel %vm756_vm4, %v3200_v47, %v1616_v27 }
 0x22a   : > { %v1672_v16 = vpop.permute.xlu0 %1671 }
 0x22b   : > { %v1704_v31 = vsel %vm777_vm5, %v1688_v61, %v1672_v16 }
 0x22c   : > { %v1614_v28 = vpop.permute.xlu1 %1613 }
 0x22d   : > { %v1686_v40 = vsel %vm756_vm4, %v3234_v12, %v1614_v28 }
 0x230   : > { %v1670_v29 = vpop.permute.xlu1 %1669 }
 0x231   : > { %v1702_v33 = vsel %vm777_vm5, %v1686_v40, %v1670_v29 }
 0x232   : > { %2534 = vmatmul.mubr.msk.bf16.vlgmr.msra.gmra.mxu1 %vm833_vm6, %v1702_v33  ;;  %2569 = vmatprep.mubr.msk.bf16.mxu0 %vm833_vm6, %v1702_v33 }
 0x233   : > { %2550 = vmatpush3.bf16.msra.mxu1 %v1872_v30  ;;  %2537 = vmatprep.mubr.msk.bf16.mxu1 %vm833_vm6, %v1704_v31 }
 0x234   : > { %v1620_v57 = vpop.permute.xlu0 %1619  ;;  %2570 = vmatmul.mubr.msk.bf16.vlgmr.msra.gmra.mxu0 %vm833_vm6, %v1704_v31 }
 0x235   : > { %v1618_v12 = vpop.permute.xlu1 %1617  ;;  %v1692_v36 = vsel %vm756_vm4, %v3268_v32, %v1620_v57 }
 0x236   : > { %v1690_v44 = vsel %vm756_vm4, %v3280_v43, %v1618_v12 }
 0x238   : > { %v1676_v35 = vpop.permute.xlu0 %1675 }
 0x239   : > { %v1674_v47 = vpop.permute.xlu1 %1673  ;;  %v1708_v39 = vsel %vm777_vm5, %v1692_v36, %v1676_v35  ;;  %v2640_v36 = vld [vmem:[%s2776_s13 + $0x30] sm:$0xff] }
 0x23a   : > { %v1706_v37 = vsel %vm777_vm5, %v1690_v44, %v1674_v47 }
 0x23b   : > { %2538 = vmatmul.mubr.msk.bf16.gmra.mxu1 %vm833_vm6, %v1706_v37  ;;  %2573 = vmatprep.mubr.msk.bf16.mxu0 %vm833_vm6, %v1706_v37 }
 0x23c   : > { %2541 = vmatprep.mubr.msk.bf16.mxu1 %vm833_vm6, %v1708_v39  ;;  %2574 = vmatmul.mubr.msk.bf16.gmra.mxu0 %vm833_vm6, %v1708_v39  ;;  %v1624_v7 = vpop.permute.xlu0 %1623 }
 0x23d   : > { %v1622_v3 = vpop.permute.xlu1 %1621  ;;  %v1696_v4 = vsel %vm756_vm4, %v3308_v60, %v1624_v7 }
 0x23e   : > { %v1694_v43 = vsel %vm756_vm4, %v3354_v42, %v1622_v3 }
 0x240   : > { %v1728_v22 = vpop.permute.xlu0 %1727 }
 0x241   : > { %v1678_v54 = vpop.permute.xlu1 %1677  ;;  %v1737_v42 = vsel %vm756_vm4, %v3368_v38, %v1728_v22  ;;  %v2641_v22 = vld [vmem:[%s2776_s13 + $0x20] sm:$0xff] }
 0x242   : > { %v1710_v32 = vsel %vm777_vm5, %v1694_v43, %v1678_v54 }
 0x243   : > { %2542 = vmatmul.mubr.msk.bf16.gmra.mxu1 %vm833_vm6, %v1710_v32  ;;  %2577 = vmatprep.mubr.msk.bf16.mxu0 %vm833_vm6, %v1710_v32 }
 0x244   : > { %v1610_v13 = vpop.permute.xlu0 %1609 }
 0x245   : > { %v1680_v45 = vpop.permute.xlu1 %1679  ;;  %v1682_v60 = vsel %vm756_vm4, %v3141_v23, %v1610_v13 }
 0x246   : > { %v1712_v46 = vsel %vm777_vm5, %v1696_v4, %v1680_v45 }
 0x247   : > { %2545 = vmatprep.mubr.msk.bf16.mxu1 %vm833_vm6, %v1712_v46  ;;  %2578 = vmatmul.mubr.msk.bf16.gmra.mxu0 %vm833_vm6, %v1712_v46 }
 0x248   : > { %v1984_v51 = vpop.permute.xlu0 %1983 }
 0x249   : > { %v1735_v48 = vpop.permute.xlu1 %1734  ;;  %v1993_v1 = vsel %vm756_vm4, %v3392_v55, %v1984_v51 }
 0x24a   : > { %v1739_v59 = vsel %vm777_vm5, %v1737_v42, %v1735_v48 }
 0x24b   : > { %2546 = vmatmul.mubr.msk.bf16.gmra.mxu1 %vm833_vm6, %v1739_v59  ;;  %2581 = vmatprep.mubr.msk.bf16.mxu0 %vm833_vm6, %v1739_v59  ;;  %v2642_v59 = vld [vmem:[%s2776_s13 + $0x38] sm:$0xff] }
 0x24d   : > { %v1666_v49 = vpop.permute.xlu1 %1665 }
 0x24e   : > { %v1698_v50 = vsel %vm777_vm5, %v1682_v60, %v1666_v49 }
 0x24f   : > { %2551 = vmatprep.mubr.msk.bf16.mxu1 %vm833_vm6, %v1698_v50 }
 0x251   : > { %v1991_v38 = vpop.permute.xlu1 %1990 }
 0x252   : > { %v1995_v52 = vsel %vm777_vm5, %v1993_v1, %v1991_v38 }
 0x253   : > { %2552 = vmatmul.mubr.msk.bf16.vlgmr.msra.gmra.mxu1 %vm833_vm6, %v1700_v26  ;;  %2582 = vmatmul.mubr.msk.bf16.gmra.mxu0 %vm833_vm6, %v1995_v52 }
 0x254   : > { %2555 = vmatprep.mubr.msk.bf16.mxu1 %vm833_vm6, %v1702_v33 }
 0x25b   : > { %2556 = vmatmul.mubr.msk.bf16.gmra.mxu1 %vm833_vm6, %v1704_v31 }
 0x25c   : > { %2559 = vmatprep.mubr.msk.bf16.mxu1 %vm833_vm6, %v1706_v37 }
 0x263   : > { %2560 = vmatmul.mubr.msk.bf16.gmra.mxu1 %vm833_vm6, %v1708_v39 }
 0x264   : > { %2563 = vmatprep.mubr.msk.bf16.mxu1 %vm833_vm6, %v1710_v32 }
 0x26b   : > { %2564 = vmatmul.mubr.msk.bf16.gmra.mxu1 %vm833_vm6, %v1712_v46 }
 0x2f2   : > { %v2535_v23 = vpop.f32.mrf.mxu1 }
 0x2f4   : > { %v1801_v55 = vpop.f32.mrf.mxu1  ;;  %v2571_v10 = vpop.f32.mrf.mxu0 }
 0x2f6   : > { %v2536_v8 = vpop.f32.mrf.mxu1  ;;  %v2042_v20 = vpop.f32.mrf.mxu0 }
 0x2f8   : > { %v1804_v56 = vpop.f32.mrf.mxu1  ;;  %v2572_v15 = vpop.f32.mrf.mxu0 }
 0x2fa   : > { %v2045_v5 = vpop.f32.mrf.mxu0 }
 0x2fb   : > { %v2539_v11 = vpop.f32.mrf.mxu1 }
 0x2fc   : > { %v2575_v18 = vpop.f32.mrf.mxu0 }
 0x2fd   : > { %v1817_v24 = vpop.f32.mrf.mxu1 }
 0x2fe   : > { %v2058_v63 = vpop.f32.mrf.mxu0 }
 0x2ff   : > { %v2540_v14 = vpop.f32.mrf.mxu1 }
 0x300   : > { %v2576_v21 = vpop.f32.mrf.mxu0 }
 0x301   : > { %v3487_v58 = vpop.f32.mrf.mxu1 }
 0x302   : > { %v2061_v16 = vpop.f32.mrf.mxu0 }
 0x303   : > { %v3489_v17 = vpop.f32.mrf.mxu1 }
 0x305   : > { %v3491_v2 = vpop.f32.mrf.mxu1 }
 0x307   : > { %v3493_v53 = vpop.f32.mrf.mxu1  ;;  %v2579_v33 = vpop.f32.mrf.mxu0 }
 0x309   : > { %v3495_v6 = vpop.f32.mrf.mxu1  ;;  %v2074_v43 = vpop.f32.mrf.mxu0 }
 0x30b   : > { %v3498_v34 = vpop.f32.mrf.mxu1  ;;  %v2580_v1 = vpop.f32.mrf.mxu0 }
 0x30d   : > { %v3500_v19 = vpop.f32.mrf.mxu1 }
 0x30f   : > { %v3503_v41 = vpop.f32.mrf.mxu1 }
 0x311   : > { %v3505_v9 = vpop.f32.mrf.mxu1 }
 0x313   : > { %v2553_v0 = vpop.f32.mrf.mxu1 }
 0x314   : > { %v1917_v25 = vadd.f32 %v2553_v0, %v2535_v23  ;;  %v2643_v23 = vld [vmem:[%s2776_s13 + $0x28] sm:$0xff] }
 0x315   : > { %v1908_v26 = vpop.f32.mrf.mxu1 }
 0x316   : > { %v2107_v27 = vadd.f32 %v2571_v10, %v1917_v25  ;;  %v1909_v28 = vadd.f32 %v1908_v26, %v1801_v55 }
 0x317   : > { %v2554_v40 = vpop.f32.mrf.mxu1 }
 0x318   : > { %v2130_v29 = vadd.f32 %v3511_v62, %v2107_v27  ;;  %v2105_v30 = vadd.f32 %v2042_v20, %v1909_v28  ;;  %v1920_v61 = vadd.f32 %v2554_v40, %v2536_v8 }
 0x319   : > { %v1911_v31 = vpop.f32.mrf.mxu1 }
 0x31a   : > { %v2146_v57 = vmul.f32 0.5, %v2130_v29  ;;  %v2128_v12 = vadd.f32 %v3511_v62, %v2105_v30  ;;  %v2108_v35 = vadd.f32 %v2572_v15, %v1920_v61  ;;  %v1912_v44 = vadd.f32 %v1911_v31, %v1804_v56 }
 0x31b   : > { %v2557_v47 = vpop.f32.mrf.mxu1 }
 0x31c   : > { %v2162_v37 = vadd.f32 %v2640_v36, %v2146_v57  ;;  %v2144_v39 = vmul.f32 0.5, %v2128_v12  ;;  %v2131_v3 = vadd.f32 %v3511_v62, %v2108_v35  ;;  %v2106_v7 = vadd.f32 %v2045_v5, %v1912_v44 }
 0x31d   : > { %v1933_v54 = vadd.f32 %v2557_v47, %v2539_v11  ;;  %v1924_v32 = vpop.f32.mrf.mxu1 }
 0x31e   : > { %2178 = vst.msk [vmem:[%s3518_s11 + $0x10] sm:$0xff] %vm756_vm4, %v2162_v37  ;;  %v2160_v4 = vadd.f32 %v2641_v22, %v2144_v39  ;;  %v2147_v45 = vmul.f32 0.5, %v2131_v3  ;;  %v2129_v46 = vadd.f32 %v3511_v62, %v2106_v7  ;;  %v1925_v13 = vadd.f32 %v1924_v32, %v1817_v24  ;;  %v2648_v7 = vld [vmem:[%s2776_s13 + $0x70] sm:$0xff] }
 0x31f   : > { %v2111_v42 = vadd.f32 %v2575_v18, %v1933_v54  ;;  %v2558_v48 = vpop.f32.mrf.mxu1  ;;  %v2077_v18 = vpop.f32.mrf.mxu0 }
 0x320   : > { %2176 = vst.msk [vmem:[%s3518_s11] sm:$0xff] %vm756_vm4, %v2160_v4  ;;  %v2163_v60 = vadd.f32 %v2642_v59, %v2147_v45  ;;  %v2145_v49 = vmul.f32 0.5, %v2129_v46  ;;  %v2109_v50 = vadd.f32 %v2058_v63, %v1925_v13  ;;  %v1936_v51 = vadd.f32 %v2558_v48, %v2540_v14  ;;  %v2644_v63 = vld [vmem:[%s2776_s13 + $0x50] sm:$0xff]  ;;  %v2649_v48 = vld [vmem:[%s2776_s13 + $0x60] sm:$0xff] }
 0x321   : > { %v2134_v38 = vadd.f32 %v3511_v62, %v2111_v42  ;;  %v1927_v52 = vpop.f32.mrf.mxu1  ;;  %v2583_v40 = vpop.f32.mrf.mxu0 }
 0x322   : > { %2179 = vst.msk [vmem:[%s3518_s11 + $0x18] sm:$0xff] %vm756_vm4, %v2163_v60  ;;  %v2161_v55 = vadd.f32 %v2643_v23, %v2145_v49  ;;  %v2132_v8 = vadd.f32 %v3511_v62, %v2109_v50  ;;  %v2112_v56 = vadd.f32 %v2576_v21, %v1936_v51  ;;  %v1928_v10 = vadd.f32 %v1927_v52, %v3487_v58  ;;  %v2645_v21 = vld [vmem:[%s2776_s13 + $0x40] sm:$0xff]  ;;  %v2650_v49 = vld [vmem:[%s2776_s13 + $0x78] sm:$0xff] }
 0x323   : > { %v2150_v11 = vmul.f32 0.5, %v2134_v38  ;;  %v2561_v24 = vpop.f32.mrf.mxu1  ;;  %v2090_v37 = vpop.f32.mrf.mxu0 }
 0x324   : > { %2177 = vst.msk [vmem:[%s3518_s11 + $0x8] sm:$0xff] %vm756_vm4, %v2161_v55  ;;  %v2148_v20 = vmul.f32 0.5, %v2132_v8  ;;  %v2135_v14 = vadd.f32 %v3511_v62, %v2112_v56  ;;  %v2110_v15 = vadd.f32 %v2061_v16, %v1928_v10  ;;  %v1949_v5 = vadd.f32 %v2561_v24, %v3489_v17  ;;  %v2646_v17 = vld [vmem:[%s2776_s13 + $0x58] sm:$0xff] }
 0x325   : > { %v2166_v0 = vadd.f32 %v2644_v63, %v2150_v11  ;;  %v1940_v25 = vpop.f32.mrf.mxu1  ;;  %v2584_v42 = vpop.f32.mrf.mxu0 }
 0x326   : > { %v2164_v26 = vadd.f32 %v2645_v21, %v2148_v20  ;;  %v2151_v58 = vmul.f32 0.5, %v2135_v14  ;;  %v2133_v27 = vadd.f32 %v3511_v62, %v2110_v15  ;;  %v2115_v28 = vadd.f32 %v2579_v33, %v1949_v5  ;;  %v2647_v33 = vld [vmem:[%s2776_s13 + $0x48] sm:$0xff]  ;;  %v2653_v5 = vld [vmem:[%s2835_s21] sm:$0xff] }
 0x327   : > { %2182 = vst.msk [vmem:[%s3518_s11 + $0x30] sm:$0xff] %vm756_vm4, %v2166_v0  ;;  %v1941_v16 = vadd.f32 %v1940_v25, %v3491_v2  ;;  %v2562_v29 = vpop.f32.mrf.mxu1  ;;  %v2093_v10 = vpop.f32.mrf.mxu0  ;;  %v2654_v25 = vld [vmem:[%s2835_s21 + $0x18] sm:$0xff] }
 0x328   : > { %2180 = vst.msk [vmem:[%s3518_s11 + $0x20] sm:$0xff] %vm756_vm4, %v2164_v26  ;;  %v2167_v30 = vadd.f32 %v2646_v17, %v2151_v58  ;;  %v2149_v61 = vmul.f32 0.5, %v2133_v27  ;;  %v2138_v31 = vadd.f32 %v3511_v62, %v2115_v28  ;;  %v1952_v57 = vadd.f32 %v2562_v29, %v3493_v53  ;;  %v2655_v26 = vld [vmem:[%s2835_s21 + $0x8] sm:$0xff] }
 0x329   : > { %v2113_v12 = vadd.f32 %v2074_v43, %v1941_v16  ;;  %v1943_v35 = vpop.f32.mrf.mxu1 }
 0x32a   : > { %2183 = vst.msk [vmem:[%s3518_s11 + $0x38] sm:$0xff] %vm756_vm4, %v2167_v30  ;;  %v2165_v44 = vadd.f32 %v2647_v33, %v2149_v61  ;;  %v2154_v2 = vmul.f32 0.5, %v2138_v31  ;;  %v2116_v47 = vadd.f32 %v2580_v1, %v1952_v57  ;;  %v1944_v36 = vadd.f32 %v1943_v35, %v3495_v6 }
 0x32b   : > { %v2136_v39 = vadd.f32 %v3511_v62, %v2113_v12  ;;  %v2565_v3 = vpop.f32.mrf.mxu1 }
 0x32c   : > { %2181 = vst.msk [vmem:[%s3518_s11 + $0x28] sm:$0xff] %vm756_vm4, %v2165_v44  ;;  %v2170_v53 = vadd.f32 %v2648_v7, %v2154_v2  ;;  %v2139_v43 = vadd.f32 %v3511_v62, %v2116_v47  ;;  %v2114_v54 = vadd.f32 %v2077_v18, %v1944_v36  ;;  %v1965_v32 = vadd.f32 %v2565_v3, %v3498_v34 }
 0x32d   : > { %v2152_v22 = vmul.f32 0.5, %v2136_v39  ;;  %v1956_v4 = vpop.f32.mrf.mxu1 }
 0x32e   : > { %2186 = vst.msk [vmem:[%s3518_s11 + $0x50] sm:$0xff] %vm756_vm4, %v2170_v53  ;;  %v2155_v6 = vmul.f32 0.5, %v2139_v43  ;;  %v2137_v45 = vadd.f32 %v3511_v62, %v2114_v54  ;;  %v2119_v46 = vadd.f32 %v2583_v40, %v1965_v32  ;;  %v1957_v13 = vadd.f32 %v1956_v4, %v3500_v19  ;;  %v2651_v19 = vld [vmem:[%s2776_s13 + $0x68] sm:$0xff] }
 0x32f   : > { %v2168_v59 = vadd.f32 %v2649_v48, %v2152_v22  ;;  %v2566_v60 = vpop.f32.mrf.mxu1 }
 0x330   : > { %v2171_v34 = vadd.f32 %v2650_v49, %v2155_v6  ;;  %v2153_v50 = vmul.f32 0.5, %v2137_v45  ;;  %v2142_v51 = vadd.f32 %v3511_v62, %v2119_v46  ;;  %v2117_v1 = vadd.f32 %v2090_v37, %v1957_v13 }
 0x331   : > { %2184 = vst.msk [vmem:[%s3518_s11 + $0x40] sm:$0xff] %vm756_vm4, %v2168_v59  ;;  %v1968_v38 = vadd.f32 %v2566_v60, %v3503_v41  ;;  %v1959_v52 = vpop.f32.mrf.mxu1  ;;  %v2652_v41 = vld [vmem:[%s2835_s21 + $0x10] sm:$0xff] }
 0x332   : > { %2187 = vst.msk [vmem:[%s3518_s11 + $0x58] sm:$0xff] %vm756_vm4, %v2171_v34  ;;  %v2169_v23 = vadd.f32 %v2651_v19, %v2153_v50  ;;  %v2158_v55 = vmul.f32 0.5, %v2142_v51  ;;  %v2140_v8 = vadd.f32 %v3511_v62, %v2117_v1  ;;  %v1960_v56 = vadd.f32 %v1959_v52, %v3505_v9 }
 0x333   : > { %v2120_v11 = vadd.f32 %v2584_v42, %v1968_v38 }
 0x334   : > { %2185 = vst.msk [vmem:[%s3518_s11 + $0x48] sm:$0xff] %vm756_vm4, %v2169_v23  ;;  %v2174_v24 = vadd.f32 %v2652_v41, %v2158_v55  ;;  %v2156_v20 = vmul.f32 0.5, %v2140_v8  ;;  %v2118_v14 = vadd.f32 %v2093_v10, %v1960_v56 }
 0x335   : > { %v2143_v15 = vadd.f32 %v3511_v62, %v2120_v11 }
 0x336   : > { %2190 = vst.msk [vmem:[%s3518_s11 + $0x70] sm:$0xff] %vm756_vm4, %v2174_v24  ;;  %v2172_v18 = vadd.f32 %v2653_v5, %v2156_v20  ;;  %v2141_v9 = vadd.f32 %v3511_v62, %v2118_v14 }
 0x337   : > { %v2159_v63 = vmul.f32 0.5, %v2143_v15 }
 0x338   : > { %2188 = vst.msk [vmem:[%s3518_s11 + $0x60] sm:$0xff] %vm756_vm4, %v2172_v18  ;;  %v2157_v0 = vmul.f32 0.5, %v2141_v9 }
 0x339   : > { %v2175_v21 = vadd.f32 %v2654_v25, %v2159_v63 }
 0x33a   : > { %v2173_v58 = vadd.f32 %v2655_v26, %v2157_v0 }
 0x33b   : > { %2191 = vst.msk [vmem:[%s3518_s11 + $0x78] sm:$0xff] %vm756_vm4, %v2175_v21 }
 0x33c   : > { %2189 = vst.msk [vmem:[%s3518_s11 + $0x68] sm:$0xff] %vm756_vm4, %v2173_v58 }
 0x33d PF: > { %s16_s25 = sadd.s32 1, %s2694_s25   ;;  %s3633_s21 = smov %s2686_s23 }
 0x33e   : > { %p13_p9 = scmp.ge.s32.totalorder %s16_s25, 6   ;;  %s3634_s22 = smov %s2690_s24 }
 0x33f   : > { %s3635_s23 = smov %s3638_s26  ;;  %s3636_s24 = smov %s3642_s27 }
 0x340   :  { %15 = sbr.rel (!%p13_p9) target bundleno = 3 (0x3), region = 77 }

</bundles_post_ra>
